<compile_context>
chip_gen: v6e
topology: v6e:2x2x1
jax: 0.10.0
libtpu: 0.0.40
codegen_flags: <defaults>
</compile_context>

<pallas_src>
import functools
import math

import jax
import jax.numpy as jnp
from jax.experimental import pallas as pl
from jax.experimental.pallas import tpu as pltpu

N_EMBD = 36
BLOCK_SIZE = 10
DROPOUT = 0.2          # unused at inference (identity)

C_PAD = 128            # padded channel width (lane multiple)
HS_PAD = 128           # padded per-head width (lane multiple)


def _mha_kernel(x_ref, wk_ref, wq_ref, wv_ref, wp_ref, bp_ref, o_ref,
                *, num_heads, head_size, seq_len):
    # x_ref : (T_pad, C_PAD)              wk/wq/wv_ref : (NH, C_PAD, HS_PAD)
    # wp_ref: (NH, HS_PAD, C_PAD)         bp_ref : (1, C_PAD)
    # o_ref : (T_pad, C_PAD)
    x = x_ref[...]
    t_pad = x.shape[0]
    scale = 1.0 / math.sqrt(head_size)

    # Causal mask (and mask of padded key rows if T was rounded up to 8).
    row = jax.lax.broadcasted_iota(jnp.int32, (t_pad, t_pad), 0)
    col = jax.lax.broadcasted_iota(jnp.int32, (t_pad, t_pad), 1)
    mask = (col <= row) & (col < seq_len)

    y = jnp.zeros(o_ref.shape, jnp.float32)
    for h in range(num_heads):                      # static unroll (small NH)
        q_h = jnp.dot(x, wq_ref[h], preferred_element_type=jnp.float32)
        k_h = jnp.dot(x, wk_ref[h], preferred_element_type=jnp.float32)
        v_h = jnp.dot(x, wv_ref[h], preferred_element_type=jnp.float32)

        # scores = q_h @ k_h^T (contraction over padded lane dim; pads are 0)
        s = jax.lax.dot_general(q_h, k_h, (((1,), (1,)), ((), ())),
                                preferred_element_type=jnp.float32) * scale
        s = jnp.where(mask, s, -1e30)
        s = s - jnp.max(s, axis=-1, keepdims=True)
        p = jnp.exp(s)
        p = p / jnp.sum(p, axis=-1, keepdims=True)
        # attention dropout: eval-mode identity

        o_h = jnp.dot(p, v_h, preferred_element_type=jnp.float32)
        # Fold the "concat heads -> proj" into a per-head accumulate.
        y = y + jnp.dot(o_h, wp_ref[h], preferred_element_type=jnp.float32)

    y = y + bp_ref[...]          # bias broadcast, done once outside the loop
    # output dropout: eval-mode identity
    o_ref[...] = y.astype(o_ref.dtype)


def prepare_params(w_k, w_q, w_v, w_proj, b_proj, *, num_heads, head_size):
    """Pad weights once into the per-head, lane-dense kernel layout."""
    C = num_heads * head_size

    def per_head_in(w):   # (C, C) -> (NH, C_PAD, HS_PAD); head h <- cols h*hs:(h+1)*hs
        wh = jnp.transpose(w.reshape(C, num_heads, head_size), (1, 0, 2))
        return jnp.zeros((num_heads, C_PAD, HS_PAD), w.dtype).at[
            :, :C, :head_size].set(wh)

    def per_head_out(w):  # (C, C) -> (NH, HS_PAD, C_PAD); head h <- rows h*hs:(h+1)*hs
        wh = w.reshape(num_heads, head_size, C)
        return jnp.zeros((num_heads, HS_PAD, C_PAD), w.dtype).at[
            :, :head_size, :C].set(wh)

    wk_p = per_head_in(w_k)
    wq_p = per_head_in(w_q)
    wv_p = per_head_in(w_v)
    wp_p = per_head_out(w_proj)
    bp_p = jnp.zeros((1, C_PAD), b_proj.dtype).at[0, :C].set(b_proj)
    return wk_p, wq_p, wv_p, wp_p, bp_p


def multi_head_attention(x, padded_params, *, num_heads, head_size):
    """x: (B, T, C) with C == num_heads*head_size. Returns (B, T, C)."""
    B, T, C = x.shape
    assert C == num_heads * head_size
    assert T <= BLOCK_SIZE
    wk_p, wq_p, wv_p, wp_p, bp_p = padded_params

    t_pad = -(-T // 8) * 8
    x_p = jnp.zeros((B, t_pad, C_PAD), x.dtype).at[:, :T, :C].set(x)

    kernel = functools.partial(_mha_kernel, num_heads=num_heads,
                               head_size=head_size, seq_len=T)

    out_p = pl.pallas_call(
        kernel,
        out_shape=jax.ShapeDtypeStruct((B, t_pad, C_PAD), x.dtype),
        grid=(B,),
        in_specs=[
            pl.BlockSpec((None, t_pad, C_PAD), lambda b: (b, 0, 0)),
            pl.BlockSpec((num_heads, C_PAD, HS_PAD), lambda b: (0, 0, 0)),
            pl.BlockSpec((num_heads, C_PAD, HS_PAD), lambda b: (0, 0, 0)),
            pl.BlockSpec((num_heads, C_PAD, HS_PAD), lambda b: (0, 0, 0)),
            pl.BlockSpec((num_heads, HS_PAD, C_PAD), lambda b: (0, 0, 0)),
            pl.BlockSpec((1, C_PAD), lambda b: (0, 0)),
        ],
        out_specs=pl.BlockSpec((None, t_pad, C_PAD), lambda b: (b, 0, 0)),
        compiler_params=pltpu.CompilerParams(
            dimension_semantics=("parallel",)),
    )(x_p, wk_p, wq_p, wv_p, wp_p, bp_p)

    return out_p[:, :T, :C]


def init_params(key, n_embd=N_EMBD):
    """nn.Linear-style init; weights stored pre-transposed as (in, out)."""
    kk, kq, kv, kw, kb = jax.random.split(key, 5)
    bound = 1.0 / (n_embd ** 0.5)
    shp = (n_embd, n_embd)
    w_k = jax.random.uniform(kk, shp, jnp.float32, -bound, bound)
    w_q = jax.random.uniform(kq, shp, jnp.float32, -bound, bound)
    w_v = jax.random.uniform(kv, shp, jnp.float32, -bound, bound)
    w_proj = jax.random.uniform(kw, shp, jnp.float32, -bound, bound)
    b_proj = jax.random.uniform(kb, (n_embd,), jnp.float32, -bound, bound)
    return w_k, w_q, w_v, w_proj, b_proj


def mha_ref(x, w_k, w_q, w_v, w_proj, b_proj, num_heads, head_size):
    """Plain-JAX reference mirroring the PyTorch forward (eval mode)."""
    B, T, C = x.shape
    k, q, v = x @ w_k, x @ w_q, x @ w_v

    def split_heads(t):
        return t.reshape(B, T, num_heads, head_size).transpose(0, 2, 1, 3)

    k, q, v = split_heads(k), split_heads(q), split_heads(v)
    wei = jnp.einsum("bhqd,bhkd->bhqk", q, k) * (head_size ** -0.5)
    causal = jnp.tril(jnp.ones((T, T), dtype=bool))
    wei = jnp.where(causal[None, None], wei, -jnp.inf)
    wei = jax.nn.softmax(wei, axis=-1)
    out = jnp.einsum("bhqk,bhkd->bhqd", wei, v)
    out = out.transpose(0, 2, 1, 3).reshape(B, T, C)
    return out @ w_proj + b_proj


if __name__ == "__main__":
    key = jax.random.PRNGKey(0)
    kx, kp = jax.random.split(key)

    B, T = 2, 8
    NUM_HEADS, HEAD_SIZE = 6, 6            # 6 * 6 == n_embd == 36

    x = jax.random.normal(kx, (B, T, N_EMBD), dtype=jnp.float32)
    w_k, w_q, w_v, w_proj, b_proj = init_params(kp)

    padded = prepare_params(w_k, w_q, w_v, w_proj, b_proj,
                            num_heads=NUM_HEADS, head_size=HEAD_SIZE)
    out = multi_head_attention(x, padded, num_heads=NUM_HEADS,
                               head_size=HEAD_SIZE)
    jax.block_until_ready(out)

    ref = mha_ref(x, w_k, w_q, w_v, w_proj, b_proj, NUM_HEADS, HEAD_SIZE)
    assert out.shape == (B, T, N_EMBD)
    max_err = float(jnp.max(jnp.abs(out - ref)))
    assert jnp.allclose(out, ref, atol=1e-4, rtol=1e-4), f"max_abs_err={max_err}"

    print("KERNEL_OK")
</pallas_src>

<mosaic_0001>
module attributes {stable_mosaic.version = 11 : i64} {
  func.func @_mha_kernel(%arg0: i32, %arg1: memref<1x8x128xf32, #tpu.memory_space<vmem>>, %arg2: memref<6x128x128xf32, #tpu.memory_space<vmem>>, %arg3: memref<6x128x128xf32, #tpu.memory_space<vmem>>, %arg4: memref<6x128x128xf32, #tpu.memory_space<vmem>>, %arg5: memref<6x128x128xf32, #tpu.memory_space<vmem>>, %arg6: memref<1x128xf32, #tpu.memory_space<vmem>>, %arg7: memref<1x8x128xf32, #tpu.memory_space<vmem>>) attributes {dimension_semantics = [#tpu.dimension_semantics<parallel>], iteration_bounds = array<i64: 2>, scalar_prefetch = 0 : i64, scratch_operands = 0 : i64, tpu.core_type = #tpu.core_type<tc>, window_params = [{transform_indices = @transform_0, window_bounds = array<i64: 1, 8, 128>}, {pipeline_mode = #tpu.pipeline_mode<synchronous>, transform_indices = @transform_1, window_bounds = array<i64: 6, 128, 128>}, {pipeline_mode = #tpu.pipeline_mode<synchronous>, transform_indices = @transform_2, window_bounds = array<i64: 6, 128, 128>}, {pipeline_mode = #tpu.pipeline_mode<synchronous>, transform_indices = @transform_3, window_bounds = array<i64: 6, 128, 128>}, {pipeline_mode = #tpu.pipeline_mode<synchronous>, transform_indices = @transform_4, window_bounds = array<i64: 6, 128, 128>}, {pipeline_mode = #tpu.pipeline_mode<synchronous>, transform_indices = @transform_5, window_bounds = array<i64: 1, 128>}, {transform_indices = @transform_6, window_bounds = array<i64: 1, 8, 128>}]} {
    %c0 = arith.constant 0 : index
    %c0_0 = arith.constant 0 : index
    %c0_1 = arith.constant 0 : index
    %0 = vector.load %arg1[%c0, %c0_0, %c0_1] : memref<1x8x128xf32, #tpu.memory_space<vmem>>, vector<1x8x128xf32>
    %1 = vector.shape_cast %0 : vector<1x8x128xf32> to vector<8x128xf32>
    %2 = tpu.iota {dimensions = array<i32: 0>} : vector<8x8xi32>
    %3 = tpu.iota {dimensions = array<i32: 1>} : vector<8x8xi32>
    %4 = arith.cmpi sle, %3, %2 : vector<8x8xi32>
    %c8_i32 = arith.constant 8 : i32
    %5 = vector.broadcast %c8_i32 : i32 to vector<8x8xi32>
    %6 = arith.cmpi slt, %3, %5 : vector<8x8xi32>
    %7 = arith.andi %4, %6 : vector<8x8xi1>
    %cst = arith.constant 0.000000e+00 : f32
    %8 = vector.broadcast %cst : f32 to vector<8x128xf32>
    %c0_2 = arith.constant 0 : index
    %c0_3 = arith.constant 0 : index
    %c0_4 = arith.constant 0 : index
    %9 = vector.load %arg3[%c0_2, %c0_3, %c0_4] : memref<6x128x128xf32, #tpu.memory_space<vmem>>, vector<1x128x128xf32>
    %10 = vector.shape_cast %9 : vector<1x128x128xf32> to vector<128x128xf32>
    %cst_5 = arith.constant dense<0.000000e+00> : vector<8x128xf32>
    %11 = tpu.matmul %1, %10, %cst_5 {dimension_numbers = #tpu.dot_dimension_numbers<[1], [0], [0], [1], [0, 0, 1, 1], [], []>} : vector<8x128xf32>, vector<128x128xf32>, vector<8x128xf32> -> vector<8x128xf32>
    %c0_6 = arith.constant 0 : index
    %c0_7 = arith.constant 0 : index
    %c0_8 = arith.constant 0 : index
    %12 = vector.load %arg2[%c0_6, %c0_7, %c0_8] : memref<6x128x128xf32, #tpu.memory_space<vmem>>, vector<1x128x128xf32>
    %13 = vector.shape_cast %12 : vector<1x128x128xf32> to vector<128x128xf32>
    %cst_9 = arith.constant dense<0.000000e+00> : vector<8x128xf32>
    %14 = tpu.matmul %1, %13, %cst_9 {dimension_numbers = #tpu.dot_dimension_numbers<[1], [0], [0], [1], [0, 0, 1, 1], [], []>} : vector<8x128xf32>, vector<128x128xf32>, vector<8x128xf32> -> vector<8x128xf32>
    %c0_10 = arith.constant 0 : index
    %c0_11 = arith.constant 0 : index
    %c0_12 = arith.constant 0 : index
    %15 = vector.load %arg4[%c0_10, %c0_11, %c0_12] : memref<6x128x128xf32, #tpu.memory_space<vmem>>, vector<1x128x128xf32>
    %16 = vector.shape_cast %15 : vector<1x128x128xf32> to vector<128x128xf32>
    %cst_13 = arith.constant dense<0.000000e+00> : vector<8x128xf32>
    %17 = tpu.matmul %1, %16, %cst_13 {dimension_numbers = #tpu.dot_dimension_numbers<[1], [0], [0], [1], [0, 0, 1, 1], [], []>} : vector<8x128xf32>, vector<128x128xf32>, vector<8x128xf32> -> vector<8x128xf32>
    %cst_14 = arith.constant dense<0.000000e+00> : vector<8x8xf32>
    %18 = tpu.matmul %11, %14, %cst_14 {dimension_numbers = #tpu.dot_dimension_numbers<[1], [1], [0], [0], [0, 0, 1, 0], [], []>} : vector<8x128xf32>, vector<8x128xf32>, vector<8x8xf32> -> vector<8x8xf32>
    %cst_15 = arith.constant 0.408248305 : f32
    %19 = vector.broadcast %cst_15 : f32 to vector<8x8xf32>
    %20 = arith.mulf %18, %19 : vector<8x8xf32>
    %cst_16 = arith.constant -1.000000e+30 : f32
    %21 = vector.broadcast %cst_16 : f32 to vector<8x8xf32>
    %22 = arith.select %7, %20, %21 : vector<8x8xi1>, vector<8x8xf32>
    %cst_17 = arith.constant dense<0xFF800000> : vector<8xf32>
    %23 = vector.multi_reduction <maximumf>, %22, %cst_17 [1] : vector<8x8xf32> to vector<8xf32>
    %24 = vector.shape_cast %23 : vector<8xf32> to vector<8x1xf32>
    %25 = vector.broadcast %24 : vector<8x1xf32> to vector<8x8xf32>
    %26 = arith.subf %22, %25 : vector<8x8xf32>
    %27 = math.exp %26 : vector<8x8xf32>
    %cst_18 = arith.constant dense<0.000000e+00> : vector<8xf32>
    %28 = vector.multi_reduction <add>, %27, %cst_18 [1] : vector<8x8xf32> to vector<8xf32>
    %29 = vector.shape_cast %28 : vector<8xf32> to vector<8x1xf32>
    %30 = vector.broadcast %29 : vector<8x1xf32> to vector<8x8xf32>
    %31 = arith.divf %27, %30 : vector<8x8xf32>
    %cst_19 = arith.constant dense<0.000000e+00> : vector<8x128xf32>
    %32 = tpu.matmul %31, %17, %cst_19 {dimension_numbers = #tpu.dot_dimension_numbers<[1], [0], [0], [1], [0, 0, 1, 1], [], []>} : vector<8x8xf32>, vector<8x128xf32>, vector<8x128xf32> -> vector<8x128xf32>
    %c0_20 = arith.constant 0 : index
    %c0_21 = arith.constant 0 : index
    %c0_22 = arith.constant 0 : index
    %33 = vector.load %arg5[%c0_20, %c0_21, %c0_22] : memref<6x128x128xf32, #tpu.memory_space<vmem>>, vector<1x128x128xf32>
    %34 = vector.shape_cast %33 : vector<1x128x128xf32> to vector<128x128xf32>
    %cst_23 = arith.constant dense<0.000000e+00> : vector<8x128xf32>
    %35 = tpu.matmul %32, %34, %cst_23 {dimension_numbers = #tpu.dot_dimension_numbers<[1], [0], [0], [1], [0, 0, 1, 1], [], []>} : vector<8x128xf32>, vector<128x128xf32>, vector<8x128xf32> -> vector<8x128xf32>
    %36 = arith.addf %8, %35 : vector<8x128xf32>
    %c1 = arith.constant 1 : index
    %c0_24 = arith.constant 0 : index
    %c0_25 = arith.constant 0 : index
    %37 = vector.load %arg3[%c1, %c0_24, %c0_25] : memref<6x128x128xf32, #tpu.memory_space<vmem>>, vector<1x128x128xf32>
    %38 = vector.shape_cast %37 : vector<1x128x128xf32> to vector<128x128xf32>
    %cst_26 = arith.constant dense<0.000000e+00> : vector<8x128xf32>
    %39 = tpu.matmul %1, %38, %cst_26 {dimension_numbers = #tpu.dot_dimension_numbers<[1], [0], [0], [1], [0, 0, 1, 1], [], []>} : vector<8x128xf32>, vector<128x128xf32>, vector<8x128xf32> -> vector<8x128xf32>
    %c1_27 = arith.constant 1 : index
    %c0_28 = arith.constant 0 : index
    %c0_29 = arith.constant 0 : index
    %40 = vector.load %arg2[%c1_27, %c0_28, %c0_29] : memref<6x128x128xf32, #tpu.memory_space<vmem>>, vector<1x128x128xf32>
    %41 = vector.shape_cast %40 : vector<1x128x128xf32> to vector<128x128xf32>
    %cst_30 = arith.constant dense<0.000000e+00> : vector<8x128xf32>
    %42 = tpu.matmul %1, %41, %cst_30 {dimension_numbers = #tpu.dot_dimension_numbers<[1], [0], [0], [1], [0, 0, 1, 1], [], []>} : vector<8x128xf32>, vector<128x128xf32>, vector<8x128xf32> -> vector<8x128xf32>
    %c1_31 = arith.constant 1 : index
    %c0_32 = arith.constant 0 : index
    %c0_33 = arith.constant 0 : index
    %43 = vector.load %arg4[%c1_31, %c0_32, %c0_33] : memref<6x128x128xf32, #tpu.memory_space<vmem>>, vector<1x128x128xf32>
    %44 = vector.shape_cast %43 : vector<1x128x128xf32> to vector<128x128xf32>
    %cst_34 = arith.constant dense<0.000000e+00> : vector<8x128xf32>
    %45 = tpu.matmul %1, %44, %cst_34 {dimension_numbers = #tpu.dot_dimension_numbers<[1], [0], [0], [1], [0, 0, 1, 1], [], []>} : vector<8x128xf32>, vector<128x128xf32>, vector<8x128xf32> -> vector<8x128xf32>
    %cst_35 = arith.constant dense<0.000000e+00> : vector<8x8xf32>
    %46 = tpu.matmul %39, %42, %cst_35 {dimension_numbers = #tpu.dot_dimension_numbers<[1], [1], [0], [0], [0, 0, 1, 0], [], []>} : vector<8x128xf32>, vector<8x128xf32>, vector<8x8xf32> -> vector<8x8xf32>
    %cst_36 = arith.constant 0.408248305 : f32
    %47 = vector.broadcast %cst_36 : f32 to vector<8x8xf32>
    %48 = arith.mulf %46, %47 : vector<8x8xf32>
    %cst_37 = arith.constant -1.000000e+30 : f32
    %49 = vector.broadcast %cst_37 : f32 to vector<8x8xf32>
    %50 = arith.select %7, %48, %49 : vector<8x8xi1>, vector<8x8xf32>
    %cst_38 = arith.constant dense<0xFF800000> : vector<8xf32>
    %51 = vector.multi_reduction <maximumf>, %50, %cst_38 [1] : vector<8x8xf32> to vector<8xf32>
    %52 = vector.shape_cast %51 : vector<8xf32> to vector<8x1xf32>
    %53 = vector.broadcast %52 : vector<8x1xf32> to vector<8x8xf32>
    %54 = arith.subf %50, %53 : vector<8x8xf32>
    %55 = math.exp %54 : vector<8x8xf32>
    %cst_39 = arith.constant dense<0.000000e+00> : vector<8xf32>
    %56 = vector.multi_reduction <add>, %55, %cst_39 [1] : vector<8x8xf32> to vector<8xf32>
    %57 = vector.shape_cast %56 : vector<8xf32> to vector<8x1xf32>
    %58 = vector.broadcast %57 : vector<8x1xf32> to vector<8x8xf32>
    %59 = arith.divf %55, %58 : vector<8x8xf32>
    %cst_40 = arith.constant dense<0.000000e+00> : vector<8x128xf32>
    %60 = tpu.matmul %59, %45, %cst_40 {dimension_numbers = #tpu.dot_dimension_numbers<[1], [0], [0], [1], [0, 0, 1, 1], [], []>} : vector<8x8xf32>, vector<8x128xf32>, vector<8x128xf32> -> vector<8x128xf32>
    %c1_41 = arith.constant 1 : index
    %c0_42 = arith.constant 0 : index
    %c0_43 = arith.constant 0 : index
    %61 = vector.load %arg5[%c1_41, %c0_42, %c0_43] : memref<6x128x128xf32, #tpu.memory_space<vmem>>, vector<1x128x128xf32>
    %62 = vector.shape_cast %61 : vector<1x128x128xf32> to vector<128x128xf32>
    %cst_44 = arith.constant dense<0.000000e+00> : vector<8x128xf32>
    %63 = tpu.matmul %60, %62, %cst_44 {dimension_numbers = #tpu.dot_dimension_numbers<[1], [0], [0], [1], [0, 0, 1, 1], [], []>} : vector<8x128xf32>, vector<128x128xf32>, vector<8x128xf32> -> vector<8x128xf32>
    %64 = arith.addf %36, %63 : vector<8x128xf32>
    %c2 = arith.constant 2 : index
    %c0_45 = arith.constant 0 : index
    %c0_46 = arith.constant 0 : index
    %65 = vector.load %arg3[%c2, %c0_45, %c0_46] : memref<6x128x128xf32, #tpu.memory_space<vmem>>, vector<1x128x128xf32>
    %66 = vector.shape_cast %65 : vector<1x128x128xf32> to vector<128x128xf32>
    %cst_47 = arith.constant dense<0.000000e+00> : vector<8x128xf32>
    %67 = tpu.matmul %1, %66, %cst_47 {dimension_numbers = #tpu.dot_dimension_numbers<[1], [0], [0], [1], [0, 0, 1, 1], [], []>} : vector<8x128xf32>, vector<128x128xf32>, vector<8x128xf32> -> vector<8x128xf32>
    %c2_48 = arith.constant 2 : index
    %c0_49 = arith.constant 0 : index
    %c0_50 = arith.constant 0 : index
    %68 = vector.load %arg2[%c2_48, %c0_49, %c0_50] : memref<6x128x128xf32, #tpu.memory_space<vmem>>, vector<1x128x128xf32>
    %69 = vector.shape_cast %68 : vector<1x128x128xf32> to vector<128x128xf32>
    %cst_51 = arith.constant dense<0.000000e+00> : vector<8x128xf32>
    %70 = tpu.matmul %1, %69, %cst_51 {dimension_numbers = #tpu.dot_dimension_numbers<[1], [0], [0], [1], [0, 0, 1, 1], [], []>} : vector<8x128xf32>, vector<128x128xf32>, vector<8x128xf32> -> vector<8x128xf32>
    %c2_52 = arith.constant 2 : index
    %c0_53 = arith.constant 0 : index
    %c0_54 = arith.constant 0 : index
    %71 = vector.load %arg4[%c2_52, %c0_53, %c0_54] : memref<6x128x128xf32, #tpu.memory_space<vmem>>, vector<1x128x128xf32>
    %72 = vector.shape_cast %71 : vector<1x128x128xf32> to vector<128x128xf32>
    %cst_55 = arith.constant dense<0.000000e+00> : vector<8x128xf32>
    %73 = tpu.matmul %1, %72, %cst_55 {dimension_numbers = #tpu.dot_dimension_numbers<[1], [0], [0], [1], [0, 0, 1, 1], [], []>} : vector<8x128xf32>, vector<128x128xf32>, vector<8x128xf32> -> vector<8x128xf32>
    %cst_56 = arith.constant dense<0.000000e+00> : vector<8x8xf32>
    %74 = tpu.matmul %67, %70, %cst_56 {dimension_numbers = #tpu.dot_dimension_numbers<[1], [1], [0], [0], [0, 0, 1, 0], [], []>} : vector<8x128xf32>, vector<8x128xf32>, vector<8x8xf32> -> vector<8x8xf32>
    %cst_57 = arith.constant 0.408248305 : f32
    %75 = vector.broadcast %cst_57 : f32 to vector<8x8xf32>
    %76 = arith.mulf %74, %75 : vector<8x8xf32>
    %cst_58 = arith.constant -1.000000e+30 : f32
    %77 = vector.broadcast %cst_58 : f32 to vector<8x8xf32>
    %78 = arith.select %7, %76, %77 : vector<8x8xi1>, vector<8x8xf32>
    %cst_59 = arith.constant dense<0xFF800000> : vector<8xf32>
    %79 = vector.multi_reduction <maximumf>, %78, %cst_59 [1] : vector<8x8xf32> to vector<8xf32>
    %80 = vector.shape_cast %79 : vector<8xf32> to vector<8x1xf32>
    %81 = vector.broadcast %80 : vector<8x1xf32> to vector<8x8xf32>
    %82 = arith.subf %78, %81 : vector<8x8xf32>
    %83 = math.exp %82 : vector<8x8xf32>
    %cst_60 = arith.constant dense<0.000000e+00> : vector<8xf32>
    %84 = vector.multi_reduction <add>, %83, %cst_60 [1] : vector<8x8xf32> to vector<8xf32>
    %85 = vector.shape_cast %84 : vector<8xf32> to vector<8x1xf32>
    %86 = vector.broadcast %85 : vector<8x1xf32> to vector<8x8xf32>
    %87 = arith.divf %83, %86 : vector<8x8xf32>
    %cst_61 = arith.constant dense<0.000000e+00> : vector<8x128xf32>
    %88 = tpu.matmul %87, %73, %cst_61 {dimension_numbers = #tpu.dot_dimension_numbers<[1], [0], [0], [1], [0, 0, 1, 1], [], []>} : vector<8x8xf32>, vector<8x128xf32>, vector<8x128xf32> -> vector<8x128xf32>
    %c2_62 = arith.constant 2 : index
    %c0_63 = arith.constant 0 : index
    %c0_64 = arith.constant 0 : index
    %89 = vector.load %arg5[%c2_62, %c0_63, %c0_64] : memref<6x128x128xf32, #tpu.memory_space<vmem>>, vector<1x128x128xf32>
    %90 = vector.shape_cast %89 : vector<1x128x128xf32> to vector<128x128xf32>
    %cst_65 = arith.constant dense<0.000000e+00> : vector<8x128xf32>
    %91 = tpu.matmul %88, %90, %cst_65 {dimension_numbers = #tpu.dot_dimension_numbers<[1], [0], [0], [1], [0, 0, 1, 1], [], []>} : vector<8x128xf32>, vector<128x128xf32>, vector<8x128xf32> -> vector<8x128xf32>
    %92 = arith.addf %64, %91 : vector<8x128xf32>
    %c3 = arith.constant 3 : index
    %c0_66 = arith.constant 0 : index
    %c0_67 = arith.constant 0 : index
    %93 = vector.load %arg3[%c3, %c0_66, %c0_67] : memref<6x128x128xf32, #tpu.memory_space<vmem>>, vector<1x128x128xf32>
    %94 = vector.shape_cast %93 : vector<1x128x128xf32> to vector<128x128xf32>
    %cst_68 = arith.constant dense<0.000000e+00> : vector<8x128xf32>
    %95 = tpu.matmul %1, %94, %cst_68 {dimension_numbers = #tpu.dot_dimension_numbers<[1], [0], [0], [1], [0, 0, 1, 1], [], []>} : vector<8x128xf32>, vector<128x128xf32>, vector<8x128xf32> -> vector<8x128xf32>
    %c3_69 = arith.constant 3 : index
    %c0_70 = arith.constant 0 : index
    %c0_71 = arith.constant 0 : index
    %96 = vector.load %arg2[%c3_69, %c0_70, %c0_71] : memref<6x128x128xf32, #tpu.memory_space<vmem>>, vector<1x128x128xf32>
    %97 = vector.shape_cast %96 : vector<1x128x128xf32> to vector<128x128xf32>
    %cst_72 = arith.constant dense<0.000000e+00> : vector<8x128xf32>
    %98 = tpu.matmul %1, %97, %cst_72 {dimension_numbers = #tpu.dot_dimension_numbers<[1], [0], [0], [1], [0, 0, 1, 1], [], []>} : vector<8x128xf32>, vector<128x128xf32>, vector<8x128xf32> -> vector<8x128xf32>
    %c3_73 = arith.constant 3 : index
    %c0_74 = arith.constant 0 : index
    %c0_75 = arith.constant 0 : index
    %99 = vector.load %arg4[%c3_73, %c0_74, %c0_75] : memref<6x128x128xf32, #tpu.memory_space<vmem>>, vector<1x128x128xf32>
    %100 = vector.shape_cast %99 : vector<1x128x128xf32> to vector<128x128xf32>
    %cst_76 = arith.constant dense<0.000000e+00> : vector<8x128xf32>
    %101 = tpu.matmul %1, %100, %cst_76 {dimension_numbers = #tpu.dot_dimension_numbers<[1], [0], [0], [1], [0, 0, 1, 1], [], []>} : vector<8x128xf32>, vector<128x128xf32>, vector<8x128xf32> -> vector<8x128xf32>
    %cst_77 = arith.constant dense<0.000000e+00> : vector<8x8xf32>
    %102 = tpu.matmul %95, %98, %cst_77 {dimension_numbers = #tpu.dot_dimension_numbers<[1], [1], [0], [0], [0, 0, 1, 0], [], []>} : vector<8x128xf32>, vector<8x128xf32>, vector<8x8xf32> -> vector<8x8xf32>
    %cst_78 = arith.constant 0.408248305 : f32
    %103 = vector.broadcast %cst_78 : f32 to vector<8x8xf32>
    %104 = arith.mulf %102, %103 : vector<8x8xf32>
    %cst_79 = arith.constant -1.000000e+30 : f32
    %105 = vector.broadcast %cst_79 : f32 to vector<8x8xf32>
    %106 = arith.select %7, %104, %105 : vector<8x8xi1>, vector<8x8xf32>
    %cst_80 = arith.constant dense<0xFF800000> : vector<8xf32>
    %107 = vector.multi_reduction <maximumf>, %106, %cst_80 [1] : vector<8x8xf32> to vector<8xf32>
    %108 = vector.shape_cast %107 : vector<8xf32> to vector<8x1xf32>
    %109 = vector.broadcast %108 : vector<8x1xf32> to vector<8x8xf32>
    %110 = arith.subf %106, %109 : vector<8x8xf32>
    %111 = math.exp %110 : vector<8x8xf32>
    %cst_81 = arith.constant dense<0.000000e+00> : vector<8xf32>
    %112 = vector.multi_reduction <add>, %111, %cst_81 [1] : vector<8x8xf32> to vector<8xf32>
    %113 = vector.shape_cast %112 : vector<8xf32> to vector<8x1xf32>
    %114 = vector.broadcast %113 : vector<8x1xf32> to vector<8x8xf32>
    %115 = arith.divf %111, %114 : vector<8x8xf32>
    %cst_82 = arith.constant dense<0.000000e+00> : vector<8x128xf32>
    %116 = tpu.matmul %115, %101, %cst_82 {dimension_numbers = #tpu.dot_dimension_numbers<[1], [0], [0], [1], [0, 0, 1, 1], [], []>} : vector<8x8xf32>, vector<8x128xf32>, vector<8x128xf32> -> vector<8x128xf32>
    %c3_83 = arith.constant 3 : index
    %c0_84 = arith.constant 0 : index
    %c0_85 = arith.constant 0 : index
    %117 = vector.load %arg5[%c3_83, %c0_84, %c0_85] : memref<6x128x128xf32, #tpu.memory_space<vmem>>, vector<1x128x128xf32>
    %118 = vector.shape_cast %117 : vector<1x128x128xf32> to vector<128x128xf32>
    %cst_86 = arith.constant dense<0.000000e+00> : vector<8x128xf32>
    %119 = tpu.matmul %116, %118, %cst_86 {dimension_numbers = #tpu.dot_dimension_numbers<[1], [0], [0], [1], [0, 0, 1, 1], [], []>} : vector<8x128xf32>, vector<128x128xf32>, vector<8x128xf32> -> vector<8x128xf32>
    %120 = arith.addf %92, %119 : vector<8x128xf32>
    %c4 = arith.constant 4 : index
    %c0_87 = arith.constant 0 : index
    %c0_88 = arith.constant 0 : index
    %121 = vector.load %arg3[%c4, %c0_87, %c0_88] : memref<6x128x128xf32, #tpu.memory_space<vmem>>, vector<1x128x128xf32>
    %122 = vector.shape_cast %121 : vector<1x128x128xf32> to vector<128x128xf32>
    %cst_89 = arith.constant dense<0.000000e+00> : vector<8x128xf32>
    %123 = tpu.matmul %1, %122, %cst_89 {dimension_numbers = #tpu.dot_dimension_numbers<[1], [0], [0], [1], [0, 0, 1, 1], [], []>} : vector<8x128xf32>, vector<128x128xf32>, vector<8x128xf32> -> vector<8x128xf32>
    %c4_90 = arith.constant 4 : index
    %c0_91 = arith.constant 0 : index
    %c0_92 = arith.constant 0 : index
    %124 = vector.load %arg2[%c4_90, %c0_91, %c0_92] : memref<6x128x128xf32, #tpu.memory_space<vmem>>, vector<1x128x128xf32>
    %125 = vector.shape_cast %124 : vector<1x128x128xf32> to vector<128x128xf32>
    %cst_93 = arith.constant dense<0.000000e+00> : vector<8x128xf32>
    %126 = tpu.matmul %1, %125, %cst_93 {dimension_numbers = #tpu.dot_dimension_numbers<[1], [0], [0], [1], [0, 0, 1, 1], [], []>} : vector<8x128xf32>, vector<128x128xf32>, vector<8x128xf32> -> vector<8x128xf32>
    %c4_94 = arith.constant 4 : index
    %c0_95 = arith.constant 0 : index
    %c0_96 = arith.constant 0 : index
    %127 = vector.load %arg4[%c4_94, %c0_95, %c0_96] : memref<6x128x128xf32, #tpu.memory_space<vmem>>, vector<1x128x128xf32>
    %128 = vector.shape_cast %127 : vector<1x128x128xf32> to vector<128x128xf32>
    %cst_97 = arith.constant dense<0.000000e+00> : vector<8x128xf32>
    %129 = tpu.matmul %1, %128, %cst_97 {dimension_numbers = #tpu.dot_dimension_numbers<[1], [0], [0], [1], [0, 0, 1, 1], [], []>} : vector<8x128xf32>, vector<128x128xf32>, vector<8x128xf32> -> vector<8x128xf32>
    %cst_98 = arith.constant dense<0.000000e+00> : vector<8x8xf32>
    %130 = tpu.matmul %123, %126, %cst_98 {dimension_numbers = #tpu.dot_dimension_numbers<[1], [1], [0], [0], [0, 0, 1, 0], [], []>} : vector<8x128xf32>, vector<8x128xf32>, vector<8x8xf32> -> vector<8x8xf32>
    %cst_99 = arith.constant 0.408248305 : f32
    %131 = vector.broadcast %cst_99 : f32 to vector<8x8xf32>
    %132 = arith.mulf %130, %131 : vector<8x8xf32>
    %cst_100 = arith.constant -1.000000e+30 : f32
    %133 = vector.broadcast %cst_100 : f32 to vector<8x8xf32>
    %134 = arith.select %7, %132, %133 : vector<8x8xi1>, vector<8x8xf32>
    %cst_101 = arith.constant dense<0xFF800000> : vector<8xf32>
    %135 = vector.multi_reduction <maximumf>, %134, %cst_101 [1] : vector<8x8xf32> to vector<8xf32>
    %136 = vector.shape_cast %135 : vector<8xf32> to vector<8x1xf32>
    %137 = vector.broadcast %136 : vector<8x1xf32> to vector<8x8xf32>
    %138 = arith.subf %134, %137 : vector<8x8xf32>
    %139 = math.exp %138 : vector<8x8xf32>
    %cst_102 = arith.constant dense<0.000000e+00> : vector<8xf32>
    %140 = vector.multi_reduction <add>, %139, %cst_102 [1] : vector<8x8xf32> to vector<8xf32>
    %141 = vector.shape_cast %140 : vector<8xf32> to vector<8x1xf32>
    %142 = vector.broadcast %141 : vector<8x1xf32> to vector<8x8xf32>
    %143 = arith.divf %139, %142 : vector<8x8xf32>
    %cst_103 = arith.constant dense<0.000000e+00> : vector<8x128xf32>
    %144 = tpu.matmul %143, %129, %cst_103 {dimension_numbers = #tpu.dot_dimension_numbers<[1], [0], [0], [1], [0, 0, 1, 1], [], []>} : vector<8x8xf32>, vector<8x128xf32>, vector<8x128xf32> -> vector<8x128xf32>
    %c4_104 = arith.constant 4 : index
    %c0_105 = arith.constant 0 : index
    %c0_106 = arith.constant 0 : index
    %145 = vector.load %arg5[%c4_104, %c0_105, %c0_106] : memref<6x128x128xf32, #tpu.memory_space<vmem>>, vector<1x128x128xf32>
    %146 = vector.shape_cast %145 : vector<1x128x128xf32> to vector<128x128xf32>
    %cst_107 = arith.constant dense<0.000000e+00> : vector<8x128xf32>
    %147 = tpu.matmul %144, %146, %cst_107 {dimension_numbers = #tpu.dot_dimension_numbers<[1], [0], [0], [1], [0, 0, 1, 1], [], []>} : vector<8x128xf32>, vector<128x128xf32>, vector<8x128xf32> -> vector<8x128xf32>
    %148 = arith.addf %120, %147 : vector<8x128xf32>
    %c5 = arith.constant 5 : index
    %c0_108 = arith.constant 0 : index
    %c0_109 = arith.constant 0 : index
    %149 = vector.load %arg3[%c5, %c0_108, %c0_109] : memref<6x128x128xf32, #tpu.memory_space<vmem>>, vector<1x128x128xf32>
    %150 = vector.shape_cast %149 : vector<1x128x128xf32> to vector<128x128xf32>
    %cst_110 = arith.constant dense<0.000000e+00> : vector<8x128xf32>
    %151 = tpu.matmul %1, %150, %cst_110 {dimension_numbers = #tpu.dot_dimension_numbers<[1], [0], [0], [1], [0, 0, 1, 1], [], []>} : vector<8x128xf32>, vector<128x128xf32>, vector<8x128xf32> -> vector<8x128xf32>
    %c5_111 = arith.constant 5 : index
    %c0_112 = arith.constant 0 : index
    %c0_113 = arith.constant 0 : index
    %152 = vector.load %arg2[%c5_111, %c0_112, %c0_113] : memref<6x128x128xf32, #tpu.memory_space<vmem>>, vector<1x128x128xf32>
    %153 = vector.shape_cast %152 : vector<1x128x128xf32> to vector<128x128xf32>
    %cst_114 = arith.constant dense<0.000000e+00> : vector<8x128xf32>
    %154 = tpu.matmul %1, %153, %cst_114 {dimension_numbers = #tpu.dot_dimension_numbers<[1], [0], [0], [1], [0, 0, 1, 1], [], []>} : vector<8x128xf32>, vector<128x128xf32>, vector<8x128xf32> -> vector<8x128xf32>
    %c5_115 = arith.constant 5 : index
    %c0_116 = arith.constant 0 : index
    %c0_117 = arith.constant 0 : index
    %155 = vector.load %arg4[%c5_115, %c0_116, %c0_117] : memref<6x128x128xf32, #tpu.memory_space<vmem>>, vector<1x128x128xf32>
    %156 = vector.shape_cast %155 : vector<1x128x128xf32> to vector<128x128xf32>
    %cst_118 = arith.constant dense<0.000000e+00> : vector<8x128xf32>
    %157 = tpu.matmul %1, %156, %cst_118 {dimension_numbers = #tpu.dot_dimension_numbers<[1], [0], [0], [1], [0, 0, 1, 1], [], []>} : vector<8x128xf32>, vector<128x128xf32>, vector<8x128xf32> -> vector<8x128xf32>
    %cst_119 = arith.constant dense<0.000000e+00> : vector<8x8xf32>
    %158 = tpu.matmul %151, %154, %cst_119 {dimension_numbers = #tpu.dot_dimension_numbers<[1], [1], [0], [0], [0, 0, 1, 0], [], []>} : vector<8x128xf32>, vector<8x128xf32>, vector<8x8xf32> -> vector<8x8xf32>
    %cst_120 = arith.constant 0.408248305 : f32
    %159 = vector.broadcast %cst_120 : f32 to vector<8x8xf32>
    %160 = arith.mulf %158, %159 : vector<8x8xf32>
    %cst_121 = arith.constant -1.000000e+30 : f32
    %161 = vector.broadcast %cst_121 : f32 to vector<8x8xf32>
    %162 = arith.select %7, %160, %161 : vector<8x8xi1>, vector<8x8xf32>
    %cst_122 = arith.constant dense<0xFF800000> : vector<8xf32>
    %163 = vector.multi_reduction <maximumf>, %162, %cst_122 [1] : vector<8x8xf32> to vector<8xf32>
    %164 = vector.shape_cast %163 : vector<8xf32> to vector<8x1xf32>
    %165 = vector.broadcast %164 : vector<8x1xf32> to vector<8x8xf32>
    %166 = arith.subf %162, %165 : vector<8x8xf32>
    %167 = math.exp %166 : vector<8x8xf32>
    %cst_123 = arith.constant dense<0.000000e+00> : vector<8xf32>
    %168 = vector.multi_reduction <add>, %167, %cst_123 [1] : vector<8x8xf32> to vector<8xf32>
    %169 = vector.shape_cast %168 : vector<8xf32> to vector<8x1xf32>
    %170 = vector.broadcast %169 : vector<8x1xf32> to vector<8x8xf32>
    %171 = arith.divf %167, %170 : vector<8x8xf32>
    %cst_124 = arith.constant dense<0.000000e+00> : vector<8x128xf32>
    %172 = tpu.matmul %171, %157, %cst_124 {dimension_numbers = #tpu.dot_dimension_numbers<[1], [0], [0], [1], [0, 0, 1, 1], [], []>} : vector<8x8xf32>, vector<8x128xf32>, vector<8x128xf32> -> vector<8x128xf32>
    %c5_125 = arith.constant 5 : index
    %c0_126 = arith.constant 0 : index
    %c0_127 = arith.constant 0 : index
    %173 = vector.load %arg5[%c5_125, %c0_126, %c0_127] : memref<6x128x128xf32, #tpu.memory_space<vmem>>, vector<1x128x128xf32>
    %174 = vector.shape_cast %173 : vector<1x128x128xf32> to vector<128x128xf32>
    %cst_128 = arith.constant dense<0.000000e+00> : vector<8x128xf32>
    %175 = tpu.matmul %172, %174, %cst_128 {dimension_numbers = #tpu.dot_dimension_numbers<[1], [0], [0], [1], [0, 0, 1, 1], [], []>} : vector<8x128xf32>, vector<128x128xf32>, vector<8x128xf32> -> vector<8x128xf32>
    %176 = arith.addf %148, %175 : vector<8x128xf32>
    %c0_129 = arith.constant 0 : index
    %c0_130 = arith.constant 0 : index
    %177 = vector.load %arg6[%c0_129, %c0_130] : memref<1x128xf32, #tpu.memory_space<vmem>>, vector<1x128xf32>
    %178 = vector.broadcast %177 : vector<1x128xf32> to vector<8x128xf32>
    %179 = arith.addf %176, %178 : vector<8x128xf32>
    %c0_131 = arith.constant 0 : index
    %c0_132 = arith.constant 0 : index
    %c0_133 = arith.constant 0 : index
    %180 = vector.load %arg7[%c0_131, %c0_132, %c0_133] : memref<1x8x128xf32, #tpu.memory_space<vmem>>, vector<1x8x128xf32>
    %181 = vector.shape_cast %180 : vector<1x8x128xf32> to vector<8x128xf32>
    %182 = vector.shape_cast %179 : vector<8x128xf32> to vector<1x8x128xf32>
    tpu.vector_store %arg7[%c0_131, %c0_132, %c0_133], %182 {strides = array<i32>} : memref<1x8x128xf32, #tpu.memory_space<vmem>>, vector<1x8x128xf32>,
    return
  }
  func.func @transform_0(%arg0: i32) -> (i32, i32, i32) {
    %c0_i32 = arith.constant 0 : i32
    %c0_i32_0 = arith.constant 0 : i32
    %c0_i32_1 = arith.constant 0 : i32
    return %arg0, %c0_i32, %c0_i32_0 : i32, i32, i32
  }
  func.func @transform_1(%arg0: i32) -> (i32, i32, i32) {
    %c0_i32 = arith.constant 0 : i32
    %c0_i32_0 = arith.constant 0 : i32
    %c0_i32_1 = arith.constant 0 : i32
    %c0_i32_2 = arith.constant 0 : i32
    return %c0_i32, %c0_i32_0, %c0_i32_1 : i32, i32, i32
  }
  func.func @transform_2(%arg0: i32) -> (i32, i32, i32) {
    %c0_i32 = arith.constant 0 : i32
    %c0_i32_0 = arith.constant 0 : i32
    %c0_i32_1 = arith.constant 0 : i32
    %c0_i32_2 = arith.constant 0 : i32
    return %c0_i32, %c0_i32_0, %c0_i32_1 : i32, i32, i32
  }
  func.func @transform_3(%arg0: i32) -> (i32, i32, i32) {
    %c0_i32 = arith.constant 0 : i32
    %c0_i32_0 = arith.constant 0 : i32
    %c0_i32_1 = arith.constant 0 : i32
    %c0_i32_2 = arith.constant 0 : i32
    return %c0_i32, %c0_i32_0, %c0_i32_1 : i32, i32, i32
  }
  func.func @transform_4(%arg0: i32) -> (i32, i32, i32) {
    %c0_i32 = arith.constant 0 : i32
    %c0_i32_0 = arith.constant 0 : i32
    %c0_i32_1 = arith.constant 0 : i32
    %c0_i32_2 = arith.constant 0 : i32
    return %c0_i32, %c0_i32_0, %c0_i32_1 : i32, i32, i32
  }
  func.func @transform_5(%arg0: i32) -> (i32, i32) {
    %c0_i32 = arith.constant 0 : i32
    %c0_i32_0 = arith.constant 0 : i32
    %c0_i32_1 = arith.constant 0 : i32
    return %c0_i32, %c0_i32_0 : i32, i32
  }
  func.func @transform_6(%arg0: i32) -> (i32, i32, i32) {
    %c0_i32 = arith.constant 0 : i32
    %c0_i32_0 = arith.constant 0 : i32
    %c0_i32_1 = arith.constant 0 : i32
    return %arg0, %c0_i32, %c0_i32_0 : i32, i32, i32
  }
}

</mosaic_0001>

<bundles_post_ra>
// kernel: tpu_custom_call.1
= control target key start
LH: loop header
LB: loop body
LE: loop exit
PB: predicated region body
PF: predicated region fallthrough
CT: control target
= control target key end

     0   :  { %s5987_s0 = inlined_call_operand.hbm [shape: f32[2,8,128], index: 0, kind: input, shape index: {}]   ;;  %s5988_s1 = inlined_call_operand.hbm [shape: f32[6,128,128], index: 1, kind: input, shape index: {}]   ;;  %s5989_s2 = inlined_call_operand.hbm [shape: f32[6,128,128], index: 2, kind: input, shape index: {}]   ;;  %s5990_s3 = inlined_call_operand.hbm [shape: f32[6,128,128], index: 3, kind: input, shape index: {}]   ;;  %s5991_s4 = inlined_call_operand.hbm [shape: f32[6,128,128], index: 4, kind: input, shape index: {}]   ;;  %s5992_s5 = inlined_call_operand.vmem [shape: f32[1,128], index: 5, kind: input, shape index: {}]   ;;  %s5993_s6 = inlined_call_operand.hbm [shape: f32[2,8,128], index: 6, kind: output, shape index: {}]  }
   0x1   :  { %5998 = sst [smem:[#allocation16_spill]] %s5988_s1 }
   0x2   :  { %11 = vsyncpa [#allocation3], 0 }
   0x3   :  { %13 = vsyncpa [#allocation3 + $0x1], 0 }
   0x4   :  { %14 = vsyncpa [#allocation6], 0 }
   0x5   :  { %15 = vsyncpa [#allocation9], 0 }
   0x6   :  { %16 = vsyncpa [#allocation4], 0 }
   0x7   :  { %18 = vsyncpa [#allocation4 + $0x1], 0  ;;  %s5216_s21 = smov 0   ;;  %s5218_s22 = smov 0  }
   0x8   :  { %s5220_s23 = smov 0   ;;  %s5222_s24 = smov 0  }
   0x9 LB: > { %s5171_s25 = smov [#allocation5]   ;;  %s5237_s27 = sadd.s32 4294967295, %s5169_s24   ;;  %s5169_s24 = sphi %s5222_s24, %s6021_s24   ;;  %s5165_s23 = sphi %s5220_s23, %s6020_s23   ;;  %s5161_s22 = sphi %s5218_s22, %s6019_s22   ;;  %s5157_s21 = sphi %s5216_s21, %s6018_s21  }
   0xa   : > { %s198_s26 = sshll.u32 %s5171_s25, 4  ;;  %p3490_p0 = scmp.ge.s32.totalorder %s5169_s24, 1  ;;  %s199_s26 = int_to_ptr.vmem [resolvable:$true] %s198_s26 }
   0xb   : > { %p5994_p1 = scmp.eq.s32.totalorder %s5237_s27, 0  ;;  %p186_p2 = scmp.lt.s32.totalorder %s5169_s24, 3 }
   0xc   : > { %s5172_s29 = smov [#allocation8]   ;;  %s5173_s8 = smov [#allocation7]  }
   0xd   : > { %p5242_p3 = pnand %p3490_p0, %p186_p2  ;;  %s224_s30 = sshll.u32 %s5172_s29, 4  ;;  %s5255_s30 = int_to_ptr.vmem [resolvable:$true] %s224_s30 }
   0xe   : > { %s211_s9 = sshll.u32 %s5173_s8, 4  ;;  %s4976_s10 = scalar_lea.vmem %s199_s26, 12288  ;;  %s5257_s9 = int_to_ptr.vmem [resolvable:$true] %s211_s9 }
   0xf   : > { %s5999_s28 = scalar_select %p5242_p3, 1, 0 }
  0x10   : > { %p4868_p5 = pneg %p5242_p3  ;;  %p4977_p8 = scmp.ne.s32.totalorder %s199_s26, %s4976_s10 }
  0x11   : > { %p4984_p11 = scmp.lt.s32.totalorder %s199_s26, %s199_s26  ;;  %p4985_p12 = scmp.lt.s32.totalorder %s4976_s10, %s4976_s10 }
  0x12   : > { %p5251_p6 = pnand %p4868_p5, %p5994_p1 }
  0x13   : > { %p4986_p13 = por %p4985_p12, %p4984_p11 }
  0x14   : > { %p4967_p7 = pneg %p5251_p6 }
  0x16   : > { %p4979_p9 = pnand %p4977_p8, %p4967_p7 }
  0x18   : > { %p4980_p10 = pneg %p4979_p9 }
  0x1a   : > { %p4987_p0 = pnand %p4986_p13, %p4980_p10 }
  0x1c   : > { %4990 = shalt.err (!%p4987_p0)
}
  0x1d   : > { %s5174_s11 = smov 128   ;;  %s5175_s12 = smov 8  }
  0x1e   : > { %s6001_s1 = sld [smem:[#allocation16_spill]]  ;;  %s5002_s15 = scalar_lea.vmem %s5255_s30, 12288 }
  0x1f   : > { %p5003_p2 = scmp.ne.s32.totalorder %s5255_s30, %s5002_s15  ;;  %p5010_p9 = scmp.lt.s32.totalorder %s5255_s30, %s5255_s30 }
  0x20   : > { %p5011_p10 = scmp.lt.s32.totalorder %s5002_s15, %s5002_s15 }
  0x21   : > { %p5005_p5 = pnand %p5003_p2, %p4967_p7 }
  0x22   : > { %p5012_p11 = por %p5011_p10, %p5010_p9 }
  0x23   : > { %p5006_p8 = pneg %p5005_p5 }
  0x24   : > { %4871 = dma.hbm_to_vmem [thread:$0]  (!%p5251_p6), %s6001_s1, 12288, %s199_s26, [#allocation6], %s5174_s11, %s5174_s11, %s5175_s12  }
  0x25   : > { %p5013_p12 = pnand %p5012_p11, %p5006_p8 }
  0x27   : > { %5016 = shalt.err (!%p5013_p12)
}
  0x28   : > { %4877 = dma.hbm_to_vmem [thread:$0]  (!%p5251_p6), %s5990_s3, 12288, %s5255_s30, [#allocation9], %s5174_s11, %s5174_s11, %s5175_s12  }
  0x29   : > { %s5028_s18 = scalar_lea.vmem %s5257_s9, 12288  ;;  %p5036_p5 = scmp.lt.s32.totalorder %s5257_s9, %s5257_s9 }
  0x2a   : > { %p5029_p13 = scmp.ne.s32.totalorder %s5257_s9, %s5028_s18  ;;  %p5037_p8 = scmp.lt.s32.totalorder %s5028_s18, %s5028_s18 }
  0x2c   : > { %p5031_p0 = pnand %p5029_p13, %p4967_p7  ;;  %p5038_p9 = por %p5037_p8, %p5036_p5 }
  0x2e   : > { %p5032_p2 = pneg %p5031_p0 }
  0x30   : > { %p5039_p10 = pnand %p5038_p9, %p5032_p2 }
  0x32   : > { %5042 = shalt.err (!%p5039_p10)
}
  0x33   : > { %4874 = dma.hbm_to_vmem [thread:$0]  (!%p5251_p6), %s5989_s2, 12288, %s5257_s9, [#allocation6], %s5174_s11, %s5174_s11, %s5175_s12  }
  0x34   : > { %s5176_s25 = smov [#allocation10]  }
  0x35   : > { %s237_s26 = sshll.u32 %s5176_s25, 4  ;;  %s238_s26 = int_to_ptr.vmem [resolvable:$true] %s237_s26 }
  0x36   : > { %s5054_s29 = scalar_lea.vmem %s238_s26, 12288  ;;  %p5062_p0 = scmp.lt.s32.totalorder %s238_s26, %s238_s26 }
  0x37   : > { %p5055_p11 = scmp.ne.s32.totalorder %s238_s26, %s5054_s29  ;;  %p5063_p2 = scmp.lt.s32.totalorder %s5054_s29, %s5054_s29 }
  0x39   : > { %p5057_p12 = pnand %p5055_p11, %p4967_p7  ;;  %p5064_p5 = por %p5063_p2, %p5062_p0 }
  0x3b   : > { %p5058_p13 = pneg %p5057_p12 }
  0x3d   : > { %p5065_p8 = pnand %p5064_p5, %p5058_p13 }
  0x3f   : > { %5068 = shalt.err (!%p5065_p8)
}
  0x40   : > { %4880 = dma.hbm_to_vmem [thread:$0]  (!%p5251_p6), %s5991_s4, 12288, %s238_s26, [#allocation9], %s5174_s11, %s5174_s11, %s5175_s12  }
  0x41   : > { %s3489_s7 = sadd.s32 4294967294, %s5169_s24   ;;  %s5317_s9 = sadd.s32 1, %s5169_s24  }
  0x42   : > { %s28_s10 = ssub.s32 %s5169_s24, %s5317_s9  ;;  %s31_s13 = sadd.s32 1, %s5165_s23 }
  0x43   : > { %p29_p7 = scmp.eq.s32.totalorder %s28_s10, 0  ;;  %p38_p9 = scmp.ne.s32.totalorder %s5165_s23, %s5161_s22 }
  0x44   : > { %p39_p10 = scmp.eq.s32.totalorder %s5169_s24, 0  ;;  %p44_p11 = scmp.ne.s32.totalorder %s5161_s22, %s5157_s21 }
  0x45   : > { %s5328_s14 = scalar_select %p29_p7, %s5165_s23, %s31_s13  }
  0x46   : > { %p5330_p12 = por %p39_p10, %p38_p9  ;;  %p5336_p6 = por %p5994_p1, %p44_p11 }
  0x47   : > { %p173_p13 = scmp.eq.s32.totalorder %s5237_s27, 1  ;;  %p179_p0 = scmp.eq.s32.totalorder %s3489_s7, 1 }
  0x48   : > { %s6003_s11 = scalar_select %p5336_p6, 1, 0 }
  0x49   : > { %p4893_p2 = scmp.lt.s32.totalorder %s5169_s24, 2  ;;  %s254_s12 = sand.u32 1, %s5165_s23  }
  0x4a   : > { %p5343_p5 = por %p173_p13, %p38_p9  ;;  %p5347_p8 = por %p179_p0, %p44_p11 }
  0x4b   : > { %s3496_s18 = sshll.u32 %s254_s12, 3  ;;  %s3497_s19 = sshll.u32 %s5169_s24, 7 }
  0x4c   : > { %s6004_s16 = scalar_select %p5343_p5, 1, 0 }
  0x4d   : > { %s6005_s17 = scalar_select %p5347_p8, 1, 0 }
  0x4e   : > { %s5355_s26 = scalar_lea.hbm %s5987_s0, %s3497_s19  ;;  %s258_s29 = scalar_lea.vmem [#allocation2], %s3496_s18 }
  0x4f   : > { %s265_s30 = sshll.u32 %s258_s29, 4  ;;  %p5359_p7 = pnand %p4893_p2, %p5330_p12  ;;  %s266_s30 = int_to_ptr.vmem [resolvable:$true] %s265_s30 }
  0x50   : > { %s255_s7 = scalar_lea.sflag [#allocation3], %s254_s12  ;;  %s5069_s10 = scalar_lea.hbm %s5355_s26, 128 }
  0x51   : > { %p5070_p9 = scmp.ne.s32.totalorder %s5355_s26, %s5069_s10  ;;  %p5071_p10 = pneg %p5359_p7 }
  0x52   : > { %s5074_s20 = scalar_lea.hbm %s5987_s0, 256  ;;  %p5075_p0 = scmp.lt.s32.totalorder %s5355_s26, %s5987_s0 }
  0x53   : > { %p5072_p11 = pnand %p5071_p10, %p5070_p9  ;;  %p5076_p12 = scmp.lt.s32.totalorder %s5074_s20, %s5069_s10 }
  0x55   : > { %p5073_p13 = pneg %p5072_p11  ;;  %p5077_p2 = por %p5076_p12, %p5075_p0 }
  0x57   : > { %p5078_p4 = pnand %p5077_p2, %p5073_p13 }
  0x59   : > { %5081 = shalt.err (!%p5078_p4)
}
  0x5a   : > { %s5082_s15 = scalar_lea.vmem %s266_s30, 128  ;;  %s5177_s12 = smov [#allocation2]  }
  0x5b   : > { %p5083_p1 = scmp.ne.s32.totalorder %s266_s30, %s5082_s15  ;;  %s5087_s29 = sshll.u32 %s5177_s12, 4  ;;  %s5088_s29 = int_to_ptr.vmem [resolvable:$false] %s5087_s29 }
  0x5c   : > { %s5089_s1 = scalar_lea.vmem %s5088_s29, 256  ;;  %p5090_p9 = scmp.lt.s32.totalorder %s266_s30, %s5088_s29 }
  0x5d   : > { %p5085_p8 = pnand %p5083_p1, %p5071_p10  ;;  %p5091_p11 = scmp.lt.s32.totalorder %s5089_s1, %s5082_s15 }
  0x5f   : > { %p5086_p5 = pneg %p5085_p8  ;;  %p5092_p6 = por %p5091_p11, %p5090_p9 }
  0x61   : > { %p5093_p3 = pnand %p5092_p6, %p5086_p5 }
  0x63   : > { %5096 = shalt.err (!%p5093_p3)
}
  0x64   : > { %4884 = dma.hbm_to_vmem [thread:$0]  (!%p5359_p7), %s5355_s26, 128, %s266_s30, %s255_s7  }
  0x65   : > { %p6007_p13 = scmp.ne.s32.totalorder %s5999_s28, 0 }
  0x66   : > { %s5380_s10 = sand.u32 (!%p6007_p13), 1, %s5161_s22   ;;  %p6008_p1 = scmp.ne.s32.totalorder (!%p6007_p13), %s6003_s11, 0 }
  0x67   : > { %274 = sbr.rel (%p6007_p13) target bundleno = 5702 (0x1646), region = 44  ;;  %s3499_s13 = sshll.u32 (!%p6007_p13), %s5380_s10, 3 }
  0x68   : > { %s277_s19 = scalar_lea.sflag (!%p6007_p13), [#allocation3], %s5380_s10  ;;  %s5386_s1 = scalar_lea.vmem (!%p6007_p13), [#allocation2], %s3499_s13 }
  0x6c   : > { %5140 = dma.done.wait (%p6008_p1), %s277_s19, 128  }
  0x6d   : > { %5142 = vsyncadd (%p6008_p1), %s277_s19, 4294967168  ;;  %p6009_p3 = scmp.eq.s32.totalorder %s5237_s27, 0 }
  0x6f   : > { %5144 = dma.done.wait (%p6009_p3), [#allocation6], 24576   ;;  %p6010_p4 = pmov %p6009_p3 }
  0x70   : > { %p6011_p6 = pmov %p6009_p3 }
  0x71   : > { %5146 = vsyncadd (%p6010_p4), [#allocation6], 4294942720 }
  0x72   : > { %5148 = dma.done.wait (%p6011_p6), [#allocation9], 24576   ;;  %p6012_p5 = pmov %p6009_p3 }
  0x73   : > { %v5178_v0 = vmov 0.0   ;;  %vm5179_vm0 = vmmov 0   ;;  %v434_v1 = vld [vmem:[#allocation5 + $0x78] sm:$0xff]  ;;  %v433_v3 = vld [vmem:[#allocation5 + $0x70] sm:$0xff]  ;;  %v432_v5 = vld [vmem:[#allocation5 + $0x68] sm:$0xff]  ;;  %v326_v54 = vlaneseq  ;;  %vm663_vm4 = vcmask 64512  }
  0x74   : > { %5150 = vsyncadd (%p6012_p5), [#allocation9], 4294942720  ;;  %3983 = vmatprep.subr.mxu1 %v5178_v0  ;;  %3948 = vmatprep.subr.mxu0 %v5178_v0  ;;  %v348_v2 = vld [vmem:[#allocation7 + $0x78] sm:$0xff]  ;;  %v347_v4 = vld [vmem:[#allocation7 + $0x70] sm:$0xff]  ;;  %s3513_s26 = sshll.u32 %s5237_s27, 7  ;;  %s324_s30 = scalar_lea.vmem [#allocation11], %s3499_s13 }
  0x75   : > { %4015 = vmatprep.mubr.msk.f32.mxu1 %vm5179_vm0, %v5178_v0  ;;  %3980 = vmatprep.mubr.msk.f32.mxu0 %vm5179_vm0, %v5178_v0  ;;  %v346_v6 = vld [vmem:[#allocation7 + $0x68] sm:$0xff]  ;;  %v431_v7 = vld [vmem:[#allocation5 + $0x60] sm:$0xff]  ;;  %v430_v9 = vld [vmem:[#allocation5 + $0x58] sm:$0xff]  ;;  %v327_v55 = vshrl.u32 %v326_v54, 7  ;;  %v329_v56 = vand.u32 127, %v326_v54  ;;  %s3381_s8 = sshll.u32 %s324_s30, 4  ;;  %s3379_s18 = scalar_lea.hbm %s5993_s6, %s3513_s26  ;;  %s3382_s8 = int_to_ptr.vmem [resolvable:$true] %s3381_s8 }
  0x76   : > { %3984 = vmatpush3.msra.mxu1 %v434_v1  ;;  %3949 = vmatpush3.msra.mxu0 %v348_v2  ;;  %v345_v8 = vld [vmem:[#allocation7 + $0x60] sm:$0xff]  ;;  %v344_v10 = vld [vmem:[#allocation7 + $0x58] sm:$0xff]  ;;  %v429_v11 = vld [vmem:[#allocation5 + $0x50] sm:$0xff]  ;;  %s3368_s25 = scalar_lea.sflag [#allocation4], %s5380_s10  ;;  %s5097_s15 = scalar_lea.vmem %s3382_s8, 128 }
  0x77   : > { %3985 = vmatprep.subr.mxu1 %v5178_v0  ;;  %3950 = vmatprep.subr.mxu0 %v5178_v0  ;;  %v343_v12 = vld [vmem:[#allocation7 + $0x50] sm:$0xff]  ;;  %v428_v13 = vld [vmem:[#allocation5 + $0x48] sm:$0xff]  ;;  %v427_v15 = vld [vmem:[#allocation5 + $0x40] sm:$0xff]  ;;  %vm330_vm1 = vcmp.le.s32.totalorder %v329_v56, %v327_v55  ;;  %vm331_vm2 = vcmp.lt.s32.totalorder %v329_v56, 8  ;;  %p5098_p8 = scmp.ne.s32.totalorder %s3382_s8, %s5097_s15  ;;  %p6015_p7 = scmp.ne.s32.totalorder %s6004_s16, 0 }
  0x78   : > { %3986 = vmatpush3.msra.mxu1 %v433_v3  ;;  %3951 = vmatpush3.msra.mxu0 %v347_v4  ;;  %v342_v14 = vld [vmem:[#allocation7 + $0x48] sm:$0xff]  ;;  %v341_v16 = vld [vmem:[#allocation7 + $0x40] sm:$0xff]  ;;  %v426_v17 = vld [vmem:[#allocation5 + $0x38] sm:$0xff]  ;;  %s5180_s27 = smov [#allocation11]  }
  0x79   : > { %3987 = vmatprep.subr.mxu1 %v5178_v0  ;;  %3952 = vmatprep.subr.mxu0 %v5178_v0  ;;  %v340_v18 = vld [vmem:[#allocation7 + $0x38] sm:$0xff]  ;;  %v425_v19 = vld [vmem:[#allocation5 + $0x30] sm:$0xff]  ;;  %v424_v21 = vld [vmem:[#allocation5 + $0x28] sm:$0xff]  ;;  %p5099_p10 = pnand %p5098_p8, %p6015_p7  ;;  %s5101_s12 = sshll.u32 %s5180_s27, 4  ;;  %s5102_s12 = int_to_ptr.vmem [resolvable:$false] %s5101_s12 }
  0x7a   : > { %3988 = vmatpush3.msra.mxu1 %v432_v5  ;;  %3953 = vmatpush3.msra.mxu0 %v346_v6  ;;  %v339_v20 = vld [vmem:[#allocation7 + $0x30] sm:$0xff]  ;;  %v338_v22 = vld [vmem:[#allocation7 + $0x28] sm:$0xff]  ;;  %v423_v23 = vld [vmem:[#allocation5 + $0x20] sm:$0xff]  ;;  %s5103_s29 = scalar_lea.vmem %s5102_s12, 256  ;;  %p5104_p12 = scmp.lt.s32.totalorder %s3382_s8, %s5102_s12 }
  0x7b   : > { %3989 = vmatprep.subr.mxu1 %v5178_v0  ;;  %3954 = vmatprep.subr.mxu0 %v5178_v0  ;;  %v337_v24 = vld [vmem:[#allocation7 + $0x20] sm:$0xff]  ;;  %v422_v25 = vld [vmem:[#allocation5 + $0x18] sm:$0xff]  ;;  %v421_v27 = vld [vmem:[#allocation5 + $0x10] sm:$0xff]  ;;  %p5100_p0 = pneg %p5099_p10  ;;  %p5105_p2 = scmp.lt.s32.totalorder %s5103_s29, %s5097_s15 }
  0x7c   : > { %3990 = vmatpush3.msra.mxu1 %v431_v7  ;;  %3955 = vmatpush3.msra.mxu0 %v345_v8  ;;  %v336_v26 = vld [vmem:[#allocation7 + $0x18] sm:$0xff]  ;;  %v335_v28 = vld [vmem:[#allocation7 + $0x10] sm:$0xff]  ;;  %v420_v29 = vld [vmem:[#allocation5 + $0x8] sm:$0xff] }
  0x7d   : > { %3991 = vmatprep.subr.mxu1 %v5178_v0  ;;  %3956 = vmatprep.subr.mxu0 %v5178_v0  ;;  %v334_v30 = vld [vmem:[#allocation7 + $0x8] sm:$0xff]  ;;  %v419_v31 = vld [vmem:[#allocation5] sm:$0xff]  ;;  %v5435_v33 = vld [vmem:[%s5386_s1] sm:$0xff]  ;;  %p5106_p9 = por %p5105_p2, %p5104_p12 }
  0x7e   : > { %3992 = vmatpush3.msra.mxu1 %v430_v9  ;;  %3957 = vmatpush3.msra.mxu0 %v344_v10  ;;  %v333_v32 = vld [vmem:[#allocation7] sm:$0xff]  ;;  %v520_v38 = vld [vmem:[#allocation8 + $0x78] sm:$0xff]  ;;  %v519_v39 = vld [vmem:[#allocation8 + $0x70] sm:$0xff] }
  0x7f   : > { %3993 = vmatprep.subr.mxu1 %v5178_v0  ;;  %3958 = vmatprep.subr.mxu0 %v5178_v0  ;;  %v518_v40 = vld [vmem:[#allocation8 + $0x68] sm:$0xff]  ;;  %v517_v41 = vld [vmem:[#allocation8 + $0x60] sm:$0xff]  ;;  %v516_v42 = vld [vmem:[#allocation8 + $0x58] sm:$0xff]  ;;  %p5107_p11 = pnand %p5106_p9, %p5100_p0 }
  0x80   : > { %3994 = vmatpush3.msra.mxu1 %v429_v11  ;;  %3959 = vmatpush3.msra.mxu0 %v343_v12  ;;  %v515_v43 = vld [vmem:[#allocation8 + $0x50] sm:$0xff]  ;;  %v514_v44 = vld [vmem:[#allocation8 + $0x48] sm:$0xff]  ;;  %v513_v45 = vld [vmem:[#allocation8 + $0x40] sm:$0xff] }
  0x81   : > { %3995 = vmatprep.subr.mxu1 %v5178_v0  ;;  %3960 = vmatprep.subr.mxu0 %v5178_v0  ;;  %v512_v46 = vld [vmem:[#allocation8 + $0x38] sm:$0xff]  ;;  %v511_v47 = vld [vmem:[#allocation8 + $0x30] sm:$0xff]  ;;  %v510_v48 = vld [vmem:[#allocation8 + $0x28] sm:$0xff] }
  0x82   : > { %3996 = vmatpush3.msra.mxu1 %v428_v13  ;;  %3961 = vmatpush3.msra.mxu0 %v342_v14  ;;  %v509_v49 = vld [vmem:[#allocation8 + $0x20] sm:$0xff]  ;;  %v508_v50 = vld [vmem:[#allocation8 + $0x18] sm:$0xff]  ;;  %v507_v51 = vld [vmem:[#allocation8 + $0x10] sm:$0xff] }
  0x83   : > { %3997 = vmatprep.subr.mxu1 %v5178_v0  ;;  %3962 = vmatprep.subr.mxu0 %v5178_v0  ;;  %v506_v52 = vld [vmem:[#allocation8 + $0x8] sm:$0xff]  ;;  %v505_v53 = vld [vmem:[#allocation8] sm:$0xff]  ;;  %vm5469_vm3 = vmand %vm330_vm1, %vm331_vm2 }
  0x84   : > { %3998 = vmatpush3.msra.mxu1 %v427_v15  ;;  %3963 = vmatpush3.msra.mxu0 %v341_v16  ;;  %v867_v6 = vld [vmem:[#allocation5 + $0xf8] sm:$0xff]  ;;  %v866_v7 = vld [vmem:[#allocation5 + $0xf0] sm:$0xff]  ;;  %v865_v9 = vld [vmem:[#allocation5 + $0xe8] sm:$0xff] }
  0x85   : > { %3999 = vmatprep.subr.mxu1 %v5178_v0  ;;  %3964 = vmatprep.subr.mxu0 %v5178_v0  ;;  %v864_v10 = vld [vmem:[#allocation5 + $0xe0] sm:$0xff]  ;;  %v863_v11 = vld [vmem:[#allocation5 + $0xd8] sm:$0xff]  ;;  %v862_v12 = vld [vmem:[#allocation5 + $0xd0] sm:$0xff] }
  0x86   : > { %4000 = vmatpush3.msra.mxu1 %v426_v17  ;;  %3965 = vmatpush3.msra.mxu0 %v340_v18  ;;  %v861_v13 = vld [vmem:[#allocation5 + $0xc8] sm:$0xff]  ;;  %v860_v14 = vld [vmem:[#allocation5 + $0xc0] sm:$0xff]  ;;  %v859_v15 = vld [vmem:[#allocation5 + $0xb8] sm:$0xff] }
  0x87   : > { %4001 = vmatprep.subr.mxu1 %v5178_v0  ;;  %3966 = vmatprep.subr.mxu0 %v5178_v0  ;;  %v858_v16 = vld [vmem:[#allocation5 + $0xb0] sm:$0xff]  ;;  %v857_v17 = vld [vmem:[#allocation5 + $0xa8] sm:$0xff]  ;;  %v856_v18 = vld [vmem:[#allocation5 + $0xa0] sm:$0xff] }
  0x88   : > { %4002 = vmatpush3.msra.mxu1 %v425_v19  ;;  %3967 = vmatpush3.msra.mxu0 %v339_v20  ;;  %v855_v19 = vld [vmem:[#allocation5 + $0x98] sm:$0xff]  ;;  %v854_v20 = vld [vmem:[#allocation5 + $0x90] sm:$0xff]  ;;  %v943_v54 = vld [vmem:[#allocation8 + $0xa0] sm:$0xff] }
  0x89   : > { %4003 = vmatprep.subr.mxu1 %v5178_v0  ;;  %3968 = vmatprep.subr.mxu0 %v5178_v0  ;;  %v942_v55 = vld [vmem:[#allocation8 + $0x98] sm:$0xff]  ;;  %v941_v56 = vld [vmem:[#allocation8 + $0x90] sm:$0xff]  ;;  %v3284_v58 = vld [vmem:[#allocation10 + $0x2e8] sm:$0xff] }
  0x8a   : > { %4004 = vmatpush3.msra.mxu1 %v424_v21  ;;  %3969 = vmatpush3.msra.mxu0 %v338_v22  ;;  %v853_v21 = vld [vmem:[#allocation5 + $0x88] sm:$0xff]  ;;  %v852_v22 = vld [vmem:[#allocation5 + $0x80] sm:$0xff] }
  0x8b   : > { %4005 = vmatprep.subr.mxu1 %v5178_v0  ;;  %3970 = vmatprep.subr.mxu0 %v5178_v0 }
  0x8c   : > { %4006 = vmatpush3.msra.mxu1 %v423_v23  ;;  %3971 = vmatpush3.msra.mxu0 %v337_v24 }
  0x8d   : > { %4007 = vmatprep.subr.mxu1 %v5178_v0  ;;  %3972 = vmatprep.subr.mxu0 %v5178_v0 }
  0x8e   : > { %4008 = vmatpush3.msra.mxu1 %v422_v25  ;;  %3973 = vmatpush3.msra.mxu0 %v336_v26  ;;  %v780_v26 = vld [vmem:[#allocation7 + $0xf8] sm:$0xff] }
  0x8f   : > { %4009 = vmatprep.subr.mxu1 %v5178_v0  ;;  %3974 = vmatprep.subr.mxu0 %v5178_v0 }
  0x90   : > { %4010 = vmatpush3.msra.mxu1 %v421_v27  ;;  %3975 = vmatpush3.msra.mxu0 %v335_v28  ;;  %v779_v27 = vld [vmem:[#allocation7 + $0xf0] sm:$0xff]  ;;  %v778_v28 = vld [vmem:[#allocation7 + $0xe8] sm:$0xff] }
  0x91   : > { %4011 = vmatprep.subr.mxu1 %v5178_v0  ;;  %3976 = vmatprep.subr.mxu0 %v5178_v0 }
  0x92   : > { %4012 = vmatpush3.msra.mxu1 %v420_v29  ;;  %3977 = vmatpush3.msra.mxu0 %v334_v30  ;;  %v777_v29 = vld [vmem:[#allocation7 + $0xe0] sm:$0xff]  ;;  %v776_v30 = vld [vmem:[#allocation7 + $0xd8] sm:$0xff] }
  0x93   : > { %4013 = vmatprep.subr.mxu1 %v5178_v0  ;;  %3978 = vmatprep.subr.mxu0 %v5178_v0 }
  0x94   : > { %4014 = vmatpush3.msra.mxu1 %v419_v31  ;;  %3979 = vmatpush3.msra.mxu0 %v333_v32  ;;  %v775_v31 = vld [vmem:[#allocation7 + $0xd0] sm:$0xff]  ;;  %v774_v32 = vld [vmem:[#allocation7 + $0xc8] sm:$0xff] }
  0x95   : > { %4016 = vmatmul.mubr.f32.vlgmr.msra.gmra.mxu1 %v5435_v33  ;;  %3981 = vmatmul.mubr.f32.vlgmr.msra.gmra.mxu0 %v5435_v33 }
  0x96   : > { %4053 = vmatprep.subr.mxu1 %v5178_v0  ;;  %4055 = vmatprep.mubr.msk.f32.mxu1 %vm5179_vm0, %v5178_v0 }
  0x97   : > { %4018 = vmatprep.subr.mxu0 %v5178_v0  ;;  %4050 = vmatprep.mubr.msk.f32.mxu0 %vm5179_vm0, %v5178_v0 }
  0x98   : > { %4019 = vmatpush3.msra.mxu0 %v520_v38  ;;  %v769_v38 = vld [vmem:[#allocation7 + $0xa0] sm:$0xff] }
  0x99   : > { %4020 = vmatprep.subr.mxu0 %v5178_v0 }
  0x9a   : > { %4021 = vmatpush3.msra.mxu0 %v519_v39  ;;  %v768_v39 = vld [vmem:[#allocation7 + $0x98] sm:$0xff] }
  0x9b   : > { %4022 = vmatprep.subr.mxu0 %v5178_v0 }
  0x9c   : > { %4023 = vmatpush3.msra.mxu0 %v518_v40  ;;  %v767_v40 = vld [vmem:[#allocation7 + $0x90] sm:$0xff] }
  0x9d   : > { %4024 = vmatprep.subr.mxu0 %v5178_v0 }
  0x9e   : > { %4025 = vmatpush3.msra.mxu0 %v517_v41  ;;  %v766_v41 = vld [vmem:[#allocation7 + $0x88] sm:$0xff] }
  0x9f   : > { %4026 = vmatprep.subr.mxu0 %v5178_v0 }
  0xa0   : > { %4027 = vmatpush3.msra.mxu0 %v516_v42  ;;  %v765_v42 = vld [vmem:[#allocation7 + $0x80] sm:$0xff] }
  0xa1   : > { %4028 = vmatprep.subr.mxu0 %v5178_v0 }
  0xa2   : > { %4029 = vmatpush3.msra.mxu0 %v515_v43  ;;  %v954_v43 = vld [vmem:[#allocation8 + $0xf8] sm:$0xff] }
  0xa3   : > { %4030 = vmatprep.subr.mxu0 %v5178_v0 }
  0xa4   : > { %4031 = vmatpush3.msra.mxu0 %v514_v44  ;;  %v953_v44 = vld [vmem:[#allocation8 + $0xf0] sm:$0xff] }
  0xa5   : > { %4032 = vmatprep.subr.mxu0 %v5178_v0 }
  0xa6   : > { %4033 = vmatpush3.msra.mxu0 %v513_v45  ;;  %v952_v45 = vld [vmem:[#allocation8 + $0xe8] sm:$0xff] }
  0xa7   : > { %4034 = vmatprep.subr.mxu0 %v5178_v0 }
  0xa8   : > { %4035 = vmatpush3.msra.mxu0 %v512_v46  ;;  %v951_v46 = vld [vmem:[#allocation8 + $0xe0] sm:$0xff] }
  0xa9   : > { %4036 = vmatprep.subr.mxu0 %v5178_v0 }
  0xaa   : > { %4037 = vmatpush3.msra.mxu0 %v511_v47  ;;  %v950_v47 = vld [vmem:[#allocation8 + $0xd8] sm:$0xff] }
  0xab   : > { %4038 = vmatprep.subr.mxu0 %v5178_v0 }
  0xac   : > { %4039 = vmatpush3.msra.mxu0 %v510_v48  ;;  %v949_v48 = vld [vmem:[#allocation8 + $0xd0] sm:$0xff] }
  0xad   : > { %4040 = vmatprep.subr.mxu0 %v5178_v0 }
  0xae   : > { %4041 = vmatpush3.msra.mxu0 %v509_v49  ;;  %v948_v49 = vld [vmem:[#allocation8 + $0xc8] sm:$0xff] }
  0xaf   : > { %4042 = vmatprep.subr.mxu0 %v5178_v0 }
  0xb0   : > { %4043 = vmatpush3.msra.mxu0 %v508_v50  ;;  %v947_v50 = vld [vmem:[#allocation8 + $0xc0] sm:$0xff] }
  0xb1   : > { %4044 = vmatprep.subr.mxu0 %v5178_v0 }
  0xb2   : > { %4045 = vmatpush3.msra.mxu0 %v507_v51  ;;  %v946_v51 = vld [vmem:[#allocation8 + $0xb8] sm:$0xff] }
  0xb3   : > { %4046 = vmatprep.subr.mxu0 %v5178_v0 }
  0xb4   : > { %4047 = vmatpush3.msra.mxu0 %v506_v52  ;;  %v945_v52 = vld [vmem:[#allocation8 + $0xb0] sm:$0xff] }
  0xb5   : > { %4048 = vmatprep.subr.mxu0 %v5178_v0 }
  0xb6   : > { %4049 = vmatpush3.msra.mxu0 %v505_v53  ;;  %v944_v53 = vld [vmem:[#allocation8 + $0xa8] sm:$0xff] }
  0xb7   : > { %4051 = vmatmul.mubr.f32.vlgmr.msra.gmra.mxu0 %v5435_v33  ;;  %4098 = vmatprep.subr.mxu0 %v5178_v0 }
  0xb8   : > { %4130 = vmatprep.mubr.msk.f32.mxu0 %vm5179_vm0, %v5178_v0  ;;  %4099 = vmatpush3.msra.mxu0 %v867_v6 }
  0xb9   : > { %4100 = vmatprep.subr.mxu0 %v5178_v0 }
  0xba   : > { %4101 = vmatpush3.msra.mxu0 %v866_v7 }
  0xbb   : > { %4102 = vmatprep.subr.mxu0 %v5178_v0 }
  0xbc   : > { %4103 = vmatpush3.msra.mxu0 %v865_v9 }
  0xbd   : > { %4104 = vmatprep.subr.mxu0 %v5178_v0 }
  0xbe   : > { %4105 = vmatpush3.msra.mxu0 %v864_v10 }
  0xbf   : > { %4106 = vmatprep.subr.mxu0 %v5178_v0 }
  0xc0   : > { %4107 = vmatpush3.msra.mxu0 %v863_v11 }
  0xc1   : > { %4108 = vmatprep.subr.mxu0 %v5178_v0 }
  0xc2   : > { %4109 = vmatpush3.msra.mxu0 %v862_v12 }
  0xc3   : > { %4110 = vmatprep.subr.mxu0 %v5178_v0 }
  0xc4   : > { %4111 = vmatpush3.msra.mxu0 %v861_v13 }
  0xc5   : > { %4112 = vmatprep.subr.mxu0 %v5178_v0 }
  0xc6   : > { %4113 = vmatpush3.msra.mxu0 %v860_v14 }
  0xc7   : > { %4114 = vmatprep.subr.mxu0 %v5178_v0 }
  0xc8   : > { %4115 = vmatpush3.msra.mxu0 %v859_v15  ;;  %v1197_v15 = vld [vmem:[#allocation10 + $0xf8] sm:$0xff] }
  0xc9   : > { %4116 = vmatprep.subr.mxu0 %v5178_v0 }
  0xca   : > { %4117 = vmatpush3.msra.mxu0 %v858_v16  ;;  %v1196_v16 = vld [vmem:[#allocation10 + $0xf0] sm:$0xff] }
  0xcb   : > { %4118 = vmatprep.subr.mxu0 %v5178_v0 }
  0xcc   : > { %4119 = vmatpush3.msra.mxu0 %v857_v17  ;;  %v1195_v17 = vld [vmem:[#allocation10 + $0xe8] sm:$0xff] }
  0xcd   : > { %4120 = vmatprep.subr.mxu0 %v5178_v0 }
  0xce   : > { %4121 = vmatpush3.msra.mxu0 %v856_v18  ;;  %v1194_v18 = vld [vmem:[#allocation10 + $0xe0] sm:$0xff] }
  0xcf   : > { %4122 = vmatprep.subr.mxu0 %v5178_v0 }
  0xd0   : > { %4123 = vmatpush3.msra.mxu0 %v855_v19  ;;  %v1193_v19 = vld [vmem:[#allocation10 + $0xd8] sm:$0xff] }
  0xd1   : > { %4124 = vmatprep.subr.mxu0 %v5178_v0 }
  0xd2   : > { %4125 = vmatpush3.msra.mxu0 %v854_v20  ;;  %v1192_v20 = vld [vmem:[#allocation10 + $0xd0] sm:$0xff] }
  0xd3   : > { %4126 = vmatprep.subr.mxu0 %v5178_v0 }
  0xd4   : > { %4127 = vmatpush3.msra.mxu0 %v853_v21  ;;  %v1191_v21 = vld [vmem:[#allocation10 + $0xc8] sm:$0xff] }
  0xd5   : > { %4128 = vmatprep.subr.mxu0 %v5178_v0 }
  0xd6   : > { %4129 = vmatpush3.msra.mxu0 %v852_v22  ;;  %v1190_v22 = vld [vmem:[#allocation10 + $0xc0] sm:$0xff] }
  0xd7   : > { %4131 = vmatmul.mubr.f32.vlgmr.msra.gmra.mxu0 %v5435_v33  ;;  %4178 = vmatprep.subr.mxu0 %v5178_v0 }
  0xd8   : > { %4210 = vmatprep.mubr.msk.f32.mxu0 %vm5179_vm0, %v5178_v0  ;;  %4179 = vmatpush3.msra.mxu0 %v1197_v15  ;;  %v1346_v15 = vld [vmem:[#allocation7 + $0x138] sm:$0xff] }
  0xd9   : > { %4180 = vmatprep.subr.mxu0 %v5178_v0 }
  0xda   : > { %4181 = vmatpush3.msra.mxu0 %v1196_v16  ;;  %v1345_v16 = vld [vmem:[#allocation7 + $0x130] sm:$0xff] }
  0xdb   : > { %4182 = vmatprep.subr.mxu0 %v5178_v0 }
  0xdc   : > { %4183 = vmatpush3.msra.mxu0 %v1195_v17  ;;  %v1344_v17 = vld [vmem:[#allocation7 + $0x128] sm:$0xff] }
  0xdd   : > { %4184 = vmatprep.subr.mxu0 %v5178_v0 }
  0xde   : > { %4185 = vmatpush3.msra.mxu0 %v1194_v18  ;;  %v1343_v18 = vld [vmem:[#allocation7 + $0x120] sm:$0xff] }
  0xdf   : > { %4186 = vmatprep.subr.mxu0 %v5178_v0 }
  0xe0   : > { %4187 = vmatpush3.msra.mxu0 %v1193_v19  ;;  %v1342_v19 = vld [vmem:[#allocation7 + $0x118] sm:$0xff] }
  0xe1   : > { %4188 = vmatprep.subr.mxu0 %v5178_v0 }
  0xe2   : > { %4189 = vmatpush3.msra.mxu0 %v1192_v20  ;;  %v1341_v20 = vld [vmem:[#allocation7 + $0x110] sm:$0xff] }
  0xe3   : > { %4190 = vmatprep.subr.mxu0 %v5178_v0 }
  0xe4   : > { %4191 = vmatpush3.msra.mxu0 %v1191_v21  ;;  %v1340_v21 = vld [vmem:[#allocation7 + $0x108] sm:$0xff] }
  0xe5   : > { %4192 = vmatprep.subr.mxu0 %v5178_v0 }
  0xe6   : > { %4193 = vmatpush3.msra.mxu0 %v1190_v22  ;;  %v1339_v22 = vld [vmem:[#allocation7 + $0x100] sm:$0xff] }
  0xe7   : > { %4194 = vmatprep.subr.mxu0 %v5178_v0 }
 0x155   : > { %v501_v34 = vpop.f32.mrf.mxu1  ;;  %v415_v35 = vpop.f32.mrf.mxu0 }
 0x156   : > { %4054 = vmatpush3.xpose.msra.mxu1 %v501_v34  ;;  %v773_v34 = vld [vmem:[#allocation7 + $0xc0] sm:$0xff] }
 0x157   : > { %v4017_v36 = vpop.f32.mrf.mxu1  ;;  %v3982_v37 = vpop.f32.mrf.mxu0  ;;  %4058 = vmatprep.subr.mxu1 %v5178_v0 }
 0x158   : > { %v771_v36 = vld [vmem:[#allocation7 + $0xb0] sm:$0xff]  ;;  %v770_v37 = vld [vmem:[#allocation7 + $0xa8] sm:$0xff] }
 0x159   : > { %4056 = vmatmul.mubr.f32.vlgmr.msra.gmra.mxu1 %v415_v35  ;;  %v772_v35 = vld [vmem:[#allocation7 + $0xb8] sm:$0xff] }
 0x15a   : > { %4060 = vmatprep.mubr.msk.f32.mxu1 %vm5179_vm0, %v5178_v0 }
 0x177   : > { %v587_v5 = vpop.f32.mrf.mxu0 }
 0x178   : > { %4059 = vmatpush3.msra.mxu1 %v587_v5 }
 0x179   : > { %v4052_v8 = vpop.f32.mrf.mxu0  ;;  %4063 = vmatprep.subr.mxu1 %v5178_v0 }
 0x219   : > { %v657_v57 = vpop.f32.mrf.mxu1 }
 0x21a   : > { %v661_v59 = vmul.f32 0.4082483, %v657_v57  ;;  %v940_v57 = vld [vmem:[#allocation8 + $0x88] sm:$0xff] }
 0x21b   : > { %v4057_v60 = vpop.f32.mrf.mxu1 }
 0x21c   : > { %v662_v61 = vsel %vm5469_vm3, %v661_v59, -1e+30  ;;  %v939_v59 = vld [vmem:[#allocation8 + $0x80] sm:$0xff]  ;;  %v934_v60 = vpop.f32.mrf.mxu0 }
 0x21d   : > { %v664_v62 = vsel %vm663_vm4, %v662_v61, -inf }
 0x21e   : > { %665 = vmax.xlane.f32.xlu0 %v664_v62 }
 0x2a7   : > { %v666_v63 = vpop.xlane.xlu0 %665 }
 0x2a8   : > { %v667_v1 = vsub.f32 %v662_v61, %v666_v63  ;;  %v4132_v61 = vpop.f32.mrf.mxu0 }
 0x2a9   : > { %v1432_v61 = vld [vmem:[#allocation5 + $0x130] sm:$0xff] }
 0x2aa   : > { %v668_v2 = vmul.f32 1.442695, %v667_v1 }
 0x2ac   : > { %4939 = vpow2.f32 %v668_v2 }
 0x2b9   : > { %v4940_v3 = vpop.eup %4939 }
 0x2ba   : > { %v670_v4 = vsel %vm663_vm4, %v4940_v3, 0.0 }
 0x2bb   : > { %671 = vadd.xlane.f32.xlu0 %v670_v4 }
 0x344   : > { %v672_v23 = vpop.xlane.xlu0 %671 }
 0x345   : > { %4941 = vrcp.f32 %v672_v23  ;;  %v1189_v23 = vld [vmem:[#allocation10 + $0xb8] sm:$0xff] }
 0x346   : > { %4195 = vmatpush3.msra.mxu0 %v1189_v23 }
 0x347   : > { %4196 = vmatprep.subr.mxu0 %v5178_v0 }
 0x352   : > { %v4942_v24 = vpop.eup %4941 }
 0x353   : > { %v674_v25 = vmul.f32 %v4942_v24, %v4940_v3  ;;  %v1188_v24 = vld [vmem:[#allocation10 + $0xb0] sm:$0xff] }
 0x354   : > { %4197 = vmatpush3.msra.mxu0 %v1188_v24 }
 0x355   : > { %4061 = vmatmul.mubr.msk.f32.vlgmr.msra.gmra.mxu1 %vm663_vm4, %v674_v25  ;;  %v1187_v25 = vld [vmem:[#allocation10 + $0xa8] sm:$0xff]  ;;  %4198 = vmatprep.subr.mxu0 %v5178_v0 }
 0x356   : > { %4064 = vmatpush3.msra.mxu1 %v780_v26  ;;  %4095 = vmatprep.mubr.msk.f32.mxu1 %vm5179_vm0, %v5178_v0  ;;  %v1186_v26 = vld [vmem:[#allocation10 + $0xa0] sm:$0xff] }
 0x357   : > { %4065 = vmatprep.subr.mxu1 %v5178_v0  ;;  %4199 = vmatpush3.msra.mxu0 %v1187_v25 }
 0x358   : > { %4066 = vmatpush3.msra.mxu1 %v779_v27  ;;  %4200 = vmatprep.subr.mxu0 %v5178_v0  ;;  %v1185_v27 = vld [vmem:[#allocation10 + $0x98] sm:$0xff] }
 0x359   : > { %4067 = vmatprep.subr.mxu1 %v5178_v0  ;;  %4201 = vmatpush3.msra.mxu0 %v1186_v26 }
 0x35a   : > { %4068 = vmatpush3.msra.mxu1 %v778_v28  ;;  %4202 = vmatprep.subr.mxu0 %v5178_v0  ;;  %v1184_v28 = vld [vmem:[#allocation10 + $0x90] sm:$0xff] }
 0x35b   : > { %4069 = vmatprep.subr.mxu1 %v5178_v0  ;;  %4203 = vmatpush3.msra.mxu0 %v1185_v27 }
 0x35c   : > { %4070 = vmatpush3.msra.mxu1 %v777_v29  ;;  %4204 = vmatprep.subr.mxu0 %v5178_v0  ;;  %v1183_v29 = vld [vmem:[#allocation10 + $0x88] sm:$0xff] }
 0x35d   : > { %4071 = vmatprep.subr.mxu1 %v5178_v0  ;;  %4205 = vmatpush3.msra.mxu0 %v1184_v28 }
 0x35e   : > { %4072 = vmatpush3.msra.mxu1 %v776_v30  ;;  %4206 = vmatprep.subr.mxu0 %v5178_v0  ;;  %v1182_v30 = vld [vmem:[#allocation10 + $0x80] sm:$0xff] }
 0x35f   : > { %4073 = vmatprep.subr.mxu1 %v5178_v0  ;;  %4207 = vmatpush3.msra.mxu0 %v1183_v29 }
 0x360   : > { %4074 = vmatpush3.msra.mxu1 %v775_v31  ;;  %4208 = vmatprep.subr.mxu0 %v5178_v0 }
 0x361   : > { %4075 = vmatprep.subr.mxu1 %v5178_v0  ;;  %4209 = vmatpush3.msra.mxu0 %v1182_v30 }
 0x362   : > { %4076 = vmatpush3.msra.mxu1 %v774_v32  ;;  %4248 = vmatprep.subr.mxu0 %v5178_v0 }
 0x363   : > { %4077 = vmatprep.subr.mxu1 %v5178_v0 }
 0x364   : > { %4078 = vmatpush3.msra.mxu1 %v773_v34 }
 0x365   : > { %4079 = vmatprep.subr.mxu1 %v5178_v0 }
 0x366   : > { %4080 = vmatpush3.msra.mxu1 %v772_v35  ;;  %v763_v35 = vld [vmem:[#allocation10 + $0x78] sm:$0xff] }
 0x367   : > { %4081 = vmatprep.subr.mxu1 %v5178_v0 }
 0x368   : > { %4082 = vmatpush3.msra.mxu1 %v771_v36  ;;  %v762_v36 = vld [vmem:[#allocation10 + $0x70] sm:$0xff] }
 0x369   : > { %4083 = vmatprep.subr.mxu1 %v5178_v0 }
 0x36a   : > { %4084 = vmatpush3.msra.mxu1 %v770_v37  ;;  %v761_v37 = vld [vmem:[#allocation10 + $0x68] sm:$0xff] }
 0x36b   : > { %4085 = vmatprep.subr.mxu1 %v5178_v0 }
 0x36c   : > { %4086 = vmatpush3.msra.mxu1 %v769_v38  ;;  %v760_v38 = vld [vmem:[#allocation10 + $0x60] sm:$0xff] }
 0x36d   : > { %4087 = vmatprep.subr.mxu1 %v5178_v0 }
 0x36e   : > { %4088 = vmatpush3.msra.mxu1 %v768_v39  ;;  %v759_v39 = vld [vmem:[#allocation10 + $0x58] sm:$0xff] }
 0x36f   : > { %4089 = vmatprep.subr.mxu1 %v5178_v0 }
 0x370   : > { %4090 = vmatpush3.msra.mxu1 %v767_v40  ;;  %v758_v40 = vld [vmem:[#allocation10 + $0x50] sm:$0xff] }
 0x371   : > { %4091 = vmatprep.subr.mxu1 %v5178_v0 }
 0x372   : > { %4092 = vmatpush3.msra.mxu1 %v766_v41  ;;  %v757_v41 = vld [vmem:[#allocation10 + $0x48] sm:$0xff] }
 0x373   : > { %4093 = vmatprep.subr.mxu1 %v5178_v0 }
 0x374   : > { %4094 = vmatpush3.msra.mxu1 %v765_v42  ;;  %v756_v42 = vld [vmem:[#allocation10 + $0x40] sm:$0xff] }
 0x375   : > { %4096 = vmatmul.mubr.f32.vlgmr.msra.gmra.mxu1 %v5435_v33  ;;  %4133 = vmatprep.subr.mxu1 %v5178_v0 }
 0x376   : > { %4134 = vmatpush3.msra.mxu1 %v954_v43  ;;  %4165 = vmatprep.mubr.msk.f32.mxu1 %vm5179_vm0, %v5178_v0  ;;  %v755_v43 = vld [vmem:[#allocation10 + $0x38] sm:$0xff] }
 0x377   : > { %4135 = vmatprep.subr.mxu1 %v5178_v0 }
 0x378   : > { %4136 = vmatpush3.msra.mxu1 %v953_v44  ;;  %v754_v44 = vld [vmem:[#allocation10 + $0x30] sm:$0xff] }
 0x379   : > { %4137 = vmatprep.subr.mxu1 %v5178_v0 }
 0x37a   : > { %4138 = vmatpush3.msra.mxu1 %v952_v45  ;;  %v753_v45 = vld [vmem:[#allocation10 + $0x28] sm:$0xff] }
 0x37b   : > { %4139 = vmatprep.subr.mxu1 %v5178_v0 }
 0x37c   : > { %4140 = vmatpush3.msra.mxu1 %v951_v46  ;;  %v752_v46 = vld [vmem:[#allocation10 + $0x20] sm:$0xff] }
 0x37d   : > { %4141 = vmatprep.subr.mxu1 %v5178_v0 }
 0x37e   : > { %4142 = vmatpush3.msra.mxu1 %v950_v47  ;;  %v751_v47 = vld [vmem:[#allocation10 + $0x18] sm:$0xff] }
 0x37f   : > { %4143 = vmatprep.subr.mxu1 %v5178_v0 }
 0x380   : > { %4144 = vmatpush3.msra.mxu1 %v949_v48  ;;  %v750_v48 = vld [vmem:[#allocation10 + $0x10] sm:$0xff] }
 0x381   : > { %4145 = vmatprep.subr.mxu1 %v5178_v0 }
 0x382   : > { %4146 = vmatpush3.msra.mxu1 %v948_v49  ;;  %v749_v49 = vld [vmem:[#allocation10 + $0x8] sm:$0xff] }
 0x383   : > { %4147 = vmatprep.subr.mxu1 %v5178_v0 }
 0x384   : > { %4148 = vmatpush3.msra.mxu1 %v947_v50  ;;  %v748_v50 = vld [vmem:[#allocation10] sm:$0xff] }
 0x385   : > { %4149 = vmatprep.subr.mxu1 %v5178_v0 }
 0x386   : > { %4150 = vmatpush3.msra.mxu1 %v946_v51  ;;  %v1441_v51 = vld [vmem:[#allocation5 + $0x178] sm:$0xff] }
 0x387   : > { %4151 = vmatprep.subr.mxu1 %v5178_v0 }
 0x388   : > { %4152 = vmatpush3.msra.mxu1 %v945_v52  ;;  %v1440_v52 = vld [vmem:[#allocation5 + $0x170] sm:$0xff] }
 0x389   : > { %4153 = vmatprep.subr.mxu1 %v5178_v0 }
 0x38a   : > { %4154 = vmatpush3.msra.mxu1 %v944_v53  ;;  %v1439_v53 = vld [vmem:[#allocation5 + $0x168] sm:$0xff] }
 0x38b   : > { %4155 = vmatprep.subr.mxu1 %v5178_v0 }
 0x38c   : > { %4156 = vmatpush3.msra.mxu1 %v943_v54  ;;  %v1438_v54 = vld [vmem:[#allocation5 + $0x160] sm:$0xff] }
 0x38d   : > { %4157 = vmatprep.subr.mxu1 %v5178_v0 }
 0x38e   : > { %4158 = vmatpush3.msra.mxu1 %v942_v55  ;;  %v1437_v55 = vld [vmem:[#allocation5 + $0x158] sm:$0xff] }
 0x38f   : > { %4159 = vmatprep.subr.mxu1 %v5178_v0 }
 0x390   : > { %4160 = vmatpush3.msra.mxu1 %v941_v56  ;;  %v1436_v56 = vld [vmem:[#allocation5 + $0x150] sm:$0xff] }
 0x391   : > { %4161 = vmatprep.subr.mxu1 %v5178_v0 }
 0x392   : > { %4162 = vmatpush3.msra.mxu1 %v940_v57  ;;  %v1435_v57 = vld [vmem:[#allocation5 + $0x148] sm:$0xff] }
 0x393   : > { %4163 = vmatprep.subr.mxu1 %v5178_v0 }
 0x394   : > { %4164 = vmatpush3.msra.mxu1 %v939_v59  ;;  %v1434_v59 = vld [vmem:[#allocation5 + $0x140] sm:$0xff] }
 0x395   : > { %4166 = vmatmul.mubr.f32.vlgmr.msra.gmra.mxu1 %v5435_v33  ;;  %4168 = vmatprep.subr.mxu1 %v5178_v0 }
 0x396   : > { %4170 = vmatprep.mubr.msk.f32.mxu1 %vm5179_vm0, %v5178_v0  ;;  %4169 = vmatpush3.xpose.msra.mxu1 %v934_v60  ;;  %v1433_v60 = vld [vmem:[#allocation5 + $0x138] sm:$0xff] }
 0x397   : > { %4173 = vmatprep.subr.mxu1 %v5178_v0 }
 0x415   : > { %v5539_v62 = vpop.f32.mrf.mxu1 }
 0x417   : > { %v4062_v63 = vpop.f32.mrf.mxu1 }
 0x418   : > { %v1430_v63 = vld [vmem:[#allocation5 + $0x120] sm:$0xff] }
 0x435   : > { %v847_v1 = vpop.f32.mrf.mxu1 }
 0x436   : > { %4171 = vmatmul.mubr.f32.vlgmr.msra.gmra.mxu1 %v847_v1  ;;  %v1429_v1 = vld [vmem:[#allocation5 + $0x118] sm:$0xff] }
 0x437   : > { %v4097_v2 = vpop.f32.mrf.mxu1  ;;  %4175 = vmatprep.mubr.msk.f32.mxu1 %vm5179_vm0, %v5178_v0 }
 0x438   : > { %v1428_v2 = vld [vmem:[#allocation5 + $0x110] sm:$0xff] }
 0x455   : > { %v1021_v3 = vpop.f32.mrf.mxu1 }
 0x456   : > { %4174 = vmatpush3.msra.mxu1 %v1021_v3  ;;  %v1427_v3 = vld [vmem:[#allocation5 + $0x108] sm:$0xff] }
 0x457   : > { %v4167_v4 = vpop.f32.mrf.mxu1  ;;  %4213 = vmatprep.subr.mxu1 %v5178_v0 }
 0x458   : > { %v1426_v4 = vld [vmem:[#allocation5 + $0x100] sm:$0xff] }
 0x4f6   : > { %v1091_v5 = vpop.f32.mrf.mxu1 }
 0x4f7   : > { %v1095_v6 = vmul.f32 0.4082483, %v1091_v5  ;;  %v1354_v5 = vld [vmem:[#allocation7 + $0x178] sm:$0xff] }
 0x4f8   : > { %v4172_v7 = vpop.f32.mrf.mxu1 }
 0x4f9   : > { %v1096_v8 = vsel %vm5469_vm3, %v1095_v6, -1e+30  ;;  %v1353_v7 = vld [vmem:[#allocation7 + $0x170] sm:$0xff] }
 0x4fa   : > { %v1097_v9 = vsel %vm663_vm4, %v1096_v8, -inf }
 0x4fb   : > { %1098 = vmax.xlane.f32.xlu1 %v1097_v9  ;;  %v1352_v9 = vld [vmem:[#allocation7 + $0x168] sm:$0xff] }
 0x584   : > { %v1099_v10 = vpop.xlane.xlu1 %1098 }
 0x585   : > { %v1100_v11 = vsub.f32 %v1096_v8, %v1099_v10  ;;  %v1351_v10 = vld [vmem:[#allocation7 + $0x160] sm:$0xff] }
 0x587   : > { %v1101_v12 = vmul.f32 1.442695, %v1100_v11  ;;  %v1350_v11 = vld [vmem:[#allocation7 + $0x158] sm:$0xff] }
 0x589   : > { %4943 = vpow2.f32 %v1101_v12  ;;  %v1349_v12 = vld [vmem:[#allocation7 + $0x150] sm:$0xff] }
 0x596   : > { %v4944_v13 = vpop.eup %4943 }
 0x597   : > { %v1103_v14 = vsel %vm663_vm4, %v4944_v13, 0.0 }
 0x598   : > { %1104 = vadd.xlane.f32.xlu1 %v1103_v14  ;;  %v1347_v14 = vld [vmem:[#allocation7 + $0x140] sm:$0xff] }
 0x621   : > { %v1105_v31 = vpop.xlane.xlu1 %1104 }
 0x622   : > { %4945 = vrcp.f32 %v1105_v31  ;;  %v1527_v31 = vld [vmem:[#allocation8 + $0x170] sm:$0xff] }
 0x62f   : > { %v4946_v32 = vpop.eup %4945 }
 0x630   : > { %v1107_v34 = vmul.f32 %v4946_v32, %v4944_v13  ;;  %v1348_v13 = vld [vmem:[#allocation7 + $0x148] sm:$0xff] }
 0x631   : > { %v1526_v32 = vld [vmem:[#allocation8 + $0x168] sm:$0xff] }
 0x632   : > { %4176 = vmatmul.mubr.msk.f32.vlgmr.msra.gmra.mxu1 %vm663_vm4, %v1107_v34  ;;  %v1525_v34 = vld [vmem:[#allocation8 + $0x160] sm:$0xff] }
 0x633   : > { %4214 = vmatpush3.msra.mxu1 %v763_v35  ;;  %4245 = vmatprep.mubr.msk.f32.mxu1 %vm5179_vm0, %v5178_v0  ;;  %v1524_v35 = vld [vmem:[#allocation8 + $0x158] sm:$0xff] }
 0x634   : > { %4215 = vmatprep.subr.mxu1 %v5178_v0 }
 0x635   : > { %4216 = vmatpush3.msra.mxu1 %v762_v36  ;;  %v1523_v36 = vld [vmem:[#allocation8 + $0x150] sm:$0xff] }
 0x636   : > { %4217 = vmatprep.subr.mxu1 %v5178_v0 }
 0x637   : > { %4218 = vmatpush3.msra.mxu1 %v761_v37  ;;  %v1522_v37 = vld [vmem:[#allocation8 + $0x148] sm:$0xff] }
 0x638   : > { %4219 = vmatprep.subr.mxu1 %v5178_v0 }
 0x639   : > { %4220 = vmatpush3.msra.mxu1 %v760_v38  ;;  %v1521_v38 = vld [vmem:[#allocation8 + $0x140] sm:$0xff] }
 0x63a   : > { %4221 = vmatprep.subr.mxu1 %v5178_v0 }
 0x63b   : > { %4222 = vmatpush3.msra.mxu1 %v759_v39  ;;  %v1520_v39 = vld [vmem:[#allocation8 + $0x138] sm:$0xff] }
 0x63c   : > { %4223 = vmatprep.subr.mxu1 %v5178_v0 }
 0x63d   : > { %4224 = vmatpush3.msra.mxu1 %v758_v40  ;;  %v1519_v40 = vld [vmem:[#allocation8 + $0x130] sm:$0xff] }
 0x63e   : > { %4225 = vmatprep.subr.mxu1 %v5178_v0 }
 0x63f   : > { %4226 = vmatpush3.msra.mxu1 %v757_v41  ;;  %v1518_v41 = vld [vmem:[#allocation8 + $0x128] sm:$0xff] }
 0x640   : > { %4227 = vmatprep.subr.mxu1 %v5178_v0 }
 0x641   : > { %4228 = vmatpush3.msra.mxu1 %v756_v42  ;;  %v1517_v42 = vld [vmem:[#allocation8 + $0x120] sm:$0xff] }
 0x642   : > { %4229 = vmatprep.subr.mxu1 %v5178_v0 }
 0x643   : > { %4230 = vmatpush3.msra.mxu1 %v755_v43  ;;  %v1516_v43 = vld [vmem:[#allocation8 + $0x118] sm:$0xff] }
 0x644   : > { %4231 = vmatprep.subr.mxu1 %v5178_v0 }
 0x645   : > { %4232 = vmatpush3.msra.mxu1 %v754_v44  ;;  %v1515_v44 = vld [vmem:[#allocation8 + $0x110] sm:$0xff] }
 0x646   : > { %4233 = vmatprep.subr.mxu1 %v5178_v0 }
 0x647   : > { %4234 = vmatpush3.msra.mxu1 %v753_v45  ;;  %v1514_v45 = vld [vmem:[#allocation8 + $0x108] sm:$0xff] }
 0x648   : > { %4235 = vmatprep.subr.mxu1 %v5178_v0 }
 0x649   : > { %4236 = vmatpush3.msra.mxu1 %v752_v46  ;;  %v1513_v46 = vld [vmem:[#allocation8 + $0x100] sm:$0xff] }
 0x64a   : > { %4237 = vmatprep.subr.mxu1 %v5178_v0 }
 0x64b   : > { %4238 = vmatpush3.msra.mxu1 %v751_v47  ;;  %v5649_v47 = vld [vmem:[%s5386_s1] sm:$0xff] }
 0x64c   : > { %4239 = vmatprep.subr.mxu1 %v5178_v0 }
 0x64d   : > { %4240 = vmatpush3.msra.mxu1 %v750_v48 }
 0x64e   : > { %4241 = vmatprep.subr.mxu1 %v5178_v0 }
 0x64f   : > { %4242 = vmatpush3.msra.mxu1 %v749_v49 }
 0x650   : > { %4243 = vmatprep.subr.mxu1 %v5178_v0 }
 0x651   : > { %4244 = vmatpush3.msra.mxu1 %v748_v50 }
 0x652   : > { %4246 = vmatmul.mubr.f32.vlgmr.msra.gmra.mxu1 %v5539_v62  ;;  %4283 = vmatprep.subr.mxu1 %v5178_v0  ;;  %v1431_v62 = vld [vmem:[#allocation5 + $0x128] sm:$0xff] }
 0x653   : > { %4284 = vmatpush3.msra.mxu1 %v1441_v51  ;;  %4315 = vmatprep.mubr.msk.f32.mxu1 %vm5179_vm0, %v5178_v0 }
 0x654   : > { %4285 = vmatprep.subr.mxu1 %v5178_v0 }
 0x655   : > { %4286 = vmatpush3.msra.mxu1 %v1440_v52 }
 0x656   : > { %4287 = vmatprep.subr.mxu1 %v5178_v0 }
 0x657   : > { %4288 = vmatpush3.msra.mxu1 %v1439_v53 }
 0x658   : > { %4289 = vmatprep.subr.mxu1 %v5178_v0 }
 0x659   : > { %4290 = vmatpush3.msra.mxu1 %v1438_v54 }
 0x65a   : > { %4291 = vmatprep.subr.mxu1 %v5178_v0 }
 0x65b   : > { %4292 = vmatpush3.msra.mxu1 %v1437_v55 }
 0x65c   : > { %4293 = vmatprep.subr.mxu1 %v5178_v0 }
 0x65d   : > { %4294 = vmatpush3.msra.mxu1 %v1436_v56 }
 0x65e   : > { %4295 = vmatprep.subr.mxu1 %v5178_v0 }
 0x65f   : > { %4296 = vmatpush3.msra.mxu1 %v1435_v57 }
 0x660   : > { %4297 = vmatprep.subr.mxu1 %v5178_v0 }
 0x661   : > { %4298 = vmatpush3.msra.mxu1 %v1434_v59 }
 0x662   : > { %4299 = vmatprep.subr.mxu1 %v5178_v0 }
 0x663   : > { %4300 = vmatpush3.msra.mxu1 %v1433_v60 }
 0x664   : > { %4301 = vmatprep.subr.mxu1 %v5178_v0 }
 0x665   : > { %4302 = vmatpush3.msra.mxu1 %v1432_v61 }
 0x666   : > { %4303 = vmatprep.subr.mxu1 %v5178_v0 }
 0x667   : > { %4304 = vmatpush3.msra.mxu1 %v1431_v62 }
 0x668   : > { %4305 = vmatprep.subr.mxu1 %v5178_v0 }
 0x669   : > { %4306 = vmatpush3.msra.mxu1 %v1430_v63 }
 0x66a   : > { %4307 = vmatprep.subr.mxu1 %v5178_v0 }
 0x66b   : > { %4308 = vmatpush3.msra.mxu1 %v1429_v1  ;;  %v1771_v1 = vld [vmem:[#allocation10 + $0x178] sm:$0xff] }
 0x66c   : > { %4309 = vmatprep.subr.mxu1 %v5178_v0 }
 0x66d   : > { %4310 = vmatpush3.msra.mxu1 %v1428_v2  ;;  %v1770_v2 = vld [vmem:[#allocation10 + $0x170] sm:$0xff] }
 0x66e   : > { %4311 = vmatprep.subr.mxu1 %v5178_v0 }
 0x66f   : > { %4312 = vmatpush3.msra.mxu1 %v1427_v3  ;;  %v1769_v3 = vld [vmem:[#allocation10 + $0x168] sm:$0xff] }
 0x670   : > { %4313 = vmatprep.subr.mxu1 %v5178_v0 }
 0x671   : > { %4314 = vmatpush3.msra.mxu1 %v1426_v4  ;;  %v1768_v4 = vld [vmem:[#allocation10 + $0x160] sm:$0xff] }
 0x672   : > { %4316 = vmatmul.mubr.f32.vlgmr.msra.gmra.mxu1 %v5435_v33  ;;  %4353 = vmatprep.subr.mxu1 %v5178_v0 }
 0x673   : > { %4355 = vmatprep.mubr.msk.f32.mxu1 %vm5179_vm0, %v5178_v0 }
 0x6f2   : > { %v1177_v6 = vpop.f32.mrf.mxu1 }
 0x6f3   : > { %4211 = vmatmul.mubr.f32.vlgmr.msra.gmra.mxu0 %v1177_v6  ;;  %v1766_v6 = vld [vmem:[#allocation10 + $0x150] sm:$0xff] }
 0x6f4   : > { %4249 = vmatpush3.msra.mxu0 %v1354_v5  ;;  %v4177_v8 = vpop.f32.mrf.mxu1  ;;  %4280 = vmatprep.mubr.msk.f32.mxu0 %vm5179_vm0, %v5178_v0  ;;  %v1767_v5 = vld [vmem:[#allocation10 + $0x158] sm:$0xff] }
 0x6f5   : > { %4250 = vmatprep.subr.mxu0 %v5178_v0  ;;  %v1764_v8 = vld [vmem:[#allocation10 + $0x140] sm:$0xff] }
 0x6f6   : > { %4251 = vmatpush3.msra.mxu0 %v1353_v7  ;;  %v1765_v7 = vld [vmem:[#allocation10 + $0x148] sm:$0xff] }
 0x6f7   : > { %4252 = vmatprep.subr.mxu0 %v5178_v0 }
 0x6f8   : > { %4253 = vmatpush3.msra.mxu0 %v1352_v9  ;;  %v1763_v9 = vld [vmem:[#allocation10 + $0x138] sm:$0xff] }
 0x6f9   : > { %4254 = vmatprep.subr.mxu0 %v5178_v0 }
 0x6fa   : > { %4255 = vmatpush3.msra.mxu0 %v1351_v10  ;;  %v1762_v10 = vld [vmem:[#allocation10 + $0x130] sm:$0xff] }
 0x6fb   : > { %4256 = vmatprep.subr.mxu0 %v5178_v0 }
 0x6fc   : > { %4257 = vmatpush3.msra.mxu0 %v1350_v11  ;;  %v1761_v11 = vld [vmem:[#allocation10 + $0x128] sm:$0xff] }
 0x6fd   : > { %4258 = vmatprep.subr.mxu0 %v5178_v0 }
 0x6fe   : > { %4259 = vmatpush3.msra.mxu0 %v1349_v12  ;;  %v1760_v12 = vld [vmem:[#allocation10 + $0x120] sm:$0xff] }
 0x6ff   : > { %4260 = vmatprep.subr.mxu0 %v5178_v0 }
 0x700   : > { %4261 = vmatpush3.msra.mxu0 %v1348_v13  ;;  %v1759_v13 = vld [vmem:[#allocation10 + $0x118] sm:$0xff] }
 0x701   : > { %4262 = vmatprep.subr.mxu0 %v5178_v0 }
 0x702   : > { %4263 = vmatpush3.msra.mxu0 %v1347_v14  ;;  %v1758_v14 = vld [vmem:[#allocation10 + $0x110] sm:$0xff] }
 0x703   : > { %4264 = vmatprep.subr.mxu0 %v5178_v0 }
 0x704   : > { %4265 = vmatpush3.msra.mxu0 %v1346_v15  ;;  %v1757_v15 = vld [vmem:[#allocation10 + $0x108] sm:$0xff] }
 0x705   : > { %4266 = vmatprep.subr.mxu0 %v5178_v0 }
 0x706   : > { %4267 = vmatpush3.msra.mxu0 %v1345_v16  ;;  %v1756_v16 = vld [vmem:[#allocation10 + $0x100] sm:$0xff] }
 0x707   : > { %4268 = vmatprep.subr.mxu0 %v5178_v0 }
 0x708   : > { %4269 = vmatpush3.msra.mxu0 %v1344_v17  ;;  %v1859_v17 = vld [vmem:[#allocation7 + $0x1f8] sm:$0xff] }
 0x709   : > { %4270 = vmatprep.subr.mxu0 %v5178_v0 }
 0x70a   : > { %4271 = vmatpush3.msra.mxu0 %v1343_v18  ;;  %v1858_v18 = vld [vmem:[#allocation7 + $0x1f0] sm:$0xff] }
 0x70b   : > { %4272 = vmatprep.subr.mxu0 %v5178_v0 }
 0x70c   : > { %4273 = vmatpush3.msra.mxu0 %v1342_v19  ;;  %v1857_v19 = vld [vmem:[#allocation7 + $0x1e8] sm:$0xff] }
 0x70d   : > { %4274 = vmatprep.subr.mxu0 %v5178_v0 }
 0x70e   : > { %4275 = vmatpush3.msra.mxu0 %v1341_v20  ;;  %v1856_v20 = vld [vmem:[#allocation7 + $0x1e0] sm:$0xff] }
 0x70f   : > { %4276 = vmatprep.subr.mxu0 %v5178_v0 }
 0x710   : > { %4277 = vmatpush3.msra.mxu0 %v1340_v21  ;;  %v1855_v21 = vld [vmem:[#allocation7 + $0x1d8] sm:$0xff] }
 0x711   : > { %4278 = vmatprep.subr.mxu0 %v5178_v0 }
 0x712   : > { %v5622_v23 = vpop.f32.mrf.mxu1  ;;  %4279 = vmatpush3.msra.mxu0 %v1339_v22  ;;  %v1854_v22 = vld [vmem:[#allocation7 + $0x1d0] sm:$0xff] }
 0x713   : > { %4281 = vmatmul.mubr.f32.vlgmr.msra.gmra.mxu0 %v5435_v33  ;;  %4318 = vmatprep.subr.mxu0 %v5178_v0  ;;  %v1528_v33 = vld [vmem:[#allocation8 + $0x178] sm:$0xff] }
 0x714   : > { %v4247_v24 = vpop.f32.mrf.mxu1  ;;  %4350 = vmatprep.mubr.msk.f32.mxu0 %vm5179_vm0, %v5178_v0  ;;  %4319 = vmatpush3.msra.mxu0 %v1528_v33  ;;  %v1847_v33 = vld [vmem:[#allocation7 + $0x198] sm:$0xff] }
 0x715   : > { %4320 = vmatprep.subr.mxu0 %v5178_v0  ;;  %v1853_v24 = vld [vmem:[#allocation7 + $0x1c8] sm:$0xff] }
 0x716   : > { %4321 = vmatpush3.msra.mxu0 %v1527_v31  ;;  %v1846_v31 = vld [vmem:[#allocation7 + $0x190] sm:$0xff] }
 0x717   : > { %4322 = vmatprep.subr.mxu0 %v5178_v0 }
 0x718   : > { %4323 = vmatpush3.msra.mxu0 %v1526_v32  ;;  %v1845_v32 = vld [vmem:[#allocation7 + $0x188] sm:$0xff] }
 0x719   : > { %4324 = vmatprep.subr.mxu0 %v5178_v0 }
 0x71a   : > { %4325 = vmatpush3.msra.mxu0 %v1525_v34  ;;  %v1844_v34 = vld [vmem:[#allocation7 + $0x180] sm:$0xff] }
 0x71b   : > { %4326 = vmatprep.subr.mxu0 %v5178_v0 }
 0x71c   : > { %4327 = vmatpush3.msra.mxu0 %v1524_v35  ;;  %v1946_v35 = vld [vmem:[#allocation5 + $0x1f8] sm:$0xff] }
 0x71d   : > { %4328 = vmatprep.subr.mxu0 %v5178_v0 }
 0x71e   : > { %4329 = vmatpush3.msra.mxu0 %v1523_v36 }
 0x71f   : > { %4330 = vmatprep.subr.mxu0 %v5178_v0 }
 0x720   : > { %4331 = vmatpush3.msra.mxu0 %v1522_v37  ;;  %v1945_v37 = vld [vmem:[#allocation5 + $0x1f0] sm:$0xff] }
 0x721   : > { %4332 = vmatprep.subr.mxu0 %v5178_v0 }
 0x722   : > { %4333 = vmatpush3.msra.mxu0 %v1521_v38 }
 0x723   : > { %4334 = vmatprep.subr.mxu0 %v5178_v0 }
 0x724   : > { %4335 = vmatpush3.msra.mxu0 %v1520_v39  ;;  %v1944_v39 = vld [vmem:[#allocation5 + $0x1e8] sm:$0xff] }
 0x725   : > { %4336 = vmatprep.subr.mxu0 %v5178_v0 }
 0x726   : > { %4337 = vmatpush3.msra.mxu0 %v1519_v40  ;;  %v1943_v40 = vld [vmem:[#allocation5 + $0x1e0] sm:$0xff] }
 0x727   : > { %4338 = vmatprep.subr.mxu0 %v5178_v0 }
 0x728   : > { %4339 = vmatpush3.msra.mxu0 %v1518_v41  ;;  %v1942_v41 = vld [vmem:[#allocation5 + $0x1d8] sm:$0xff] }
 0x729   : > { %4340 = vmatprep.subr.mxu0 %v5178_v0 }
 0x72a   : > { %4341 = vmatpush3.msra.mxu0 %v1517_v42  ;;  %v1941_v42 = vld [vmem:[#allocation5 + $0x1d0] sm:$0xff] }
 0x72b   : > { %4342 = vmatprep.subr.mxu0 %v5178_v0 }
 0x72c   : > { %4343 = vmatpush3.msra.mxu0 %v1516_v43  ;;  %v1940_v43 = vld [vmem:[#allocation5 + $0x1c8] sm:$0xff] }
 0x72d   : > { %4344 = vmatprep.subr.mxu0 %v5178_v0 }
 0x72e   : > { %4345 = vmatpush3.msra.mxu0 %v1515_v44  ;;  %v1939_v44 = vld [vmem:[#allocation5 + $0x1c0] sm:$0xff] }
 0x72f   : > { %4346 = vmatprep.subr.mxu0 %v5178_v0 }
 0x730   : > { %4347 = vmatpush3.msra.mxu0 %v1514_v45  ;;  %v1938_v45 = vld [vmem:[#allocation5 + $0x1b8] sm:$0xff] }
 0x731   : > { %4348 = vmatprep.subr.mxu0 %v5178_v0 }
 0x732   : > { %v1508_v25 = vpop.f32.mrf.mxu1  ;;  %4349 = vmatpush3.msra.mxu0 %v1513_v46  ;;  %v1937_v46 = vld [vmem:[#allocation5 + $0x1b0] sm:$0xff] }
 0x733   : > { %4354 = vmatpush3.xpose.msra.mxu1 %v1508_v25  ;;  %4351 = vmatmul.mubr.f32.vlgmr.msra.gmra.mxu0 %v5649_v47  ;;  %v1852_v25 = vld [vmem:[#allocation7 + $0x1c0] sm:$0xff] }
 0x734   : > { %v4317_v26 = vpop.f32.mrf.mxu1  ;;  %4358 = vmatprep.subr.mxu1 %v5178_v0  ;;  %4398 = vmatprep.subr.mxu0 %v5178_v0 }
 0x735   : > { %4430 = vmatprep.mubr.msk.f32.mxu0 %vm5179_vm0, %v5178_v0  ;;  %4399 = vmatpush3.msra.mxu0 %v1859_v17  ;;  %v1851_v26 = vld [vmem:[#allocation7 + $0x1b8] sm:$0xff] }
 0x736   : > { %4400 = vmatprep.subr.mxu0 %v5178_v0 }
 0x737   : > { %4401 = vmatpush3.msra.mxu0 %v1858_v18 }
 0x738   : > { %4402 = vmatprep.subr.mxu0 %v5178_v0 }
 0x739   : > { %4403 = vmatpush3.msra.mxu0 %v1857_v19 }
 0x73a   : > { %4404 = vmatprep.subr.mxu0 %v5178_v0 }
 0x73b   : > { %4405 = vmatpush3.msra.mxu0 %v1856_v20 }
 0x73c   : > { %4406 = vmatprep.subr.mxu0 %v5178_v0 }
 0x73d   : > { %4407 = vmatpush3.msra.mxu0 %v1855_v21 }
 0x73e   : > { %4408 = vmatprep.subr.mxu0 %v5178_v0 }
 0x73f   : > { %4409 = vmatpush3.msra.mxu0 %v1854_v22 }
 0x740   : > { %4410 = vmatprep.subr.mxu0 %v5178_v0 }
 0x741   : > { %4411 = vmatpush3.msra.mxu0 %v1853_v24 }
 0x742   : > { %4412 = vmatprep.subr.mxu0 %v5178_v0 }
 0x743   : > { %4413 = vmatpush3.msra.mxu0 %v1852_v25 }
 0x744   : > { %4414 = vmatprep.subr.mxu0 %v5178_v0 }
 0x745   : > { %4415 = vmatpush3.msra.mxu0 %v1851_v26 }
 0x746   : > { %4416 = vmatprep.subr.mxu0 %v5178_v0 }
 0x7b3   : > { %v5629_v27 = vpop.f32.mrf.mxu0 }
 0x7b5   : > { %v4212_v28 = vpop.f32.mrf.mxu0 }
 0x7b6   : > { %v1850_v28 = vld [vmem:[#allocation7 + $0x1b0] sm:$0xff] }
 0x7b7   : > { %4417 = vmatpush3.msra.mxu0 %v1850_v28 }
 0x7b8   : > { %4418 = vmatprep.subr.mxu0 %v5178_v0 }
 0x7d3   : > { %v1421_v29 = vpop.f32.mrf.mxu0 }
 0x7d4   : > { %4356 = vmatmul.mubr.f32.vlgmr.msra.gmra.mxu1 %v1421_v29  ;;  %v1849_v29 = vld [vmem:[#allocation7 + $0x1a8] sm:$0xff] }
 0x7d5   : > { %v4282_v30 = vpop.f32.mrf.mxu0  ;;  %4360 = vmatprep.mubr.msk.f32.mxu1 %vm5179_vm0, %v5178_v0  ;;  %4419 = vmatpush3.msra.mxu0 %v1849_v29 }
 0x7d6   : > { %4420 = vmatprep.subr.mxu0 %v5178_v0  ;;  %v1848_v30 = vld [vmem:[#allocation7 + $0x1a0] sm:$0xff] }
 0x7d7   : > { %4421 = vmatpush3.msra.mxu0 %v1848_v30 }
 0x7d8   : > { %4422 = vmatprep.subr.mxu0 %v5178_v0 }
 0x7d9   : > { %4423 = vmatpush3.msra.mxu0 %v1847_v33  ;;  %v2276_v33 = vld [vmem:[#allocation10 + $0x1f8] sm:$0xff] }
 0x7da   : > { %4424 = vmatprep.subr.mxu0 %v5178_v0 }
 0x7db   : > { %4425 = vmatpush3.msra.mxu0 %v1846_v31  ;;  %v2275_v31 = vld [vmem:[#allocation10 + $0x1f0] sm:$0xff] }
 0x7dc   : > { %4426 = vmatprep.subr.mxu0 %v5178_v0 }
 0x7dd   : > { %4427 = vmatpush3.msra.mxu0 %v1845_v32  ;;  %v2274_v32 = vld [vmem:[#allocation10 + $0x1e8] sm:$0xff] }
 0x7de   : > { %4428 = vmatprep.subr.mxu0 %v5178_v0 }
 0x7df   : > { %4429 = vmatpush3.msra.mxu0 %v1844_v34  ;;  %v2273_v34 = vld [vmem:[#allocation10 + $0x1e0] sm:$0xff] }
 0x7e0   : > { %4431 = vmatmul.mubr.f32.vlgmr.msra.gmra.mxu0 %v5649_v47  ;;  %4468 = vmatprep.subr.mxu0 %v5178_v0 }
 0x7e1   : > { %4500 = vmatprep.mubr.msk.f32.mxu0 %vm5179_vm0, %v5178_v0 }
 0x7f3   : > { %v1595_v59 = vpop.f32.mrf.mxu0 }
 0x7f4   : > { %4359 = vmatpush3.msra.mxu1 %v1595_v59 }
 0x7f5   : > { %v4352_v60 = vpop.f32.mrf.mxu0  ;;  %4363 = vmatprep.subr.mxu1 %v5178_v0 }
 0x894   : > { %v1665_v48 = vpop.f32.mrf.mxu1 }
 0x895   : > { %v1669_v49 = vmul.f32 0.4082483, %v1665_v48  ;;  %v1936_v48 = vld [vmem:[#allocation5 + $0x1a8] sm:$0xff] }
 0x896   : > { %v4357_v50 = vpop.f32.mrf.mxu1 }
 0x897   : > { %v1670_v51 = vsel %vm5469_vm3, %v1669_v49, -1e+30  ;;  %v1935_v49 = vld [vmem:[#allocation5 + $0x1a0] sm:$0xff]  ;;  %v1934_v50 = vld [vmem:[#allocation5 + $0x198] sm:$0xff] }
 0x898   : > { %v1671_v52 = vsel %vm663_vm4, %v1670_v51, -inf }
 0x899   : > { %1672 = vmax.xlane.f32.xlu0 %v1671_v52  ;;  %v1932_v52 = vld [vmem:[#allocation5 + $0x188] sm:$0xff] }
 0x922   : > { %v1673_v53 = vpop.xlane.xlu0 %1672 }
 0x923   : > { %v1674_v54 = vsub.f32 %v1670_v51, %v1673_v53  ;;  %v1933_v51 = vld [vmem:[#allocation5 + $0x190] sm:$0xff]  ;;  %v1931_v53 = vld [vmem:[#allocation5 + $0x180] sm:$0xff] }
 0x925   : > { %v1675_v55 = vmul.f32 1.442695, %v1674_v54  ;;  %v1926_v54 = vpop.f32.mrf.mxu0 }
 0x927   : > { %4947 = vpow2.f32 %v1675_v55  ;;  %v4432_v55 = vpop.f32.mrf.mxu0 }
 0x928   : > { %v2357_v55 = vld [vmem:[#allocation7 + $0x240] sm:$0xff] }
 0x934   : > { %v4948_v56 = vpop.eup %4947 }
 0x935   : > { %v1677_v57 = vsel %vm663_vm4, %v4948_v56, 0.0 }
 0x936   : > { %1678 = vadd.xlane.f32.xlu1 %v1677_v57 }
 0x9bf   : > { %v1679_v61 = vpop.xlane.xlu1 %1678 }
 0x9c0   : > { %4949 = vrcp.f32 %v1679_v61 }
 0x9cd   : > { %v4950_v62 = vpop.eup %4949 }
 0x9ce   : > { %v1681_v63 = vmul.f32 %v4950_v62, %v4948_v56  ;;  %v1335_v56 = vadd.f32 %v5622_v23, %v5629_v27  ;;  %v2030_v23 = vld [vmem:[#allocation8 + $0x1e0] sm:$0xff]  ;;  %v2029_v27 = vld [vmem:[#allocation8 + $0x1d8] sm:$0xff] }
 0x9d0   : > { %4361 = vmatmul.mubr.msk.f32.vlgmr.msra.gmra.mxu1 %vm663_vm4, %v1681_v63  ;;  %v2033_v63 = vld [vmem:[#allocation8 + $0x1f8] sm:$0xff] }
 0x9d1   : > { %4364 = vmatpush3.msra.mxu1 %v1771_v1  ;;  %4395 = vmatprep.mubr.msk.f32.mxu1 %vm5179_vm0, %v5178_v0  ;;  %v2032_v1 = vld [vmem:[#allocation8 + $0x1f0] sm:$0xff] }
 0x9d2   : > { %4365 = vmatprep.subr.mxu1 %v5178_v0  ;;  %4469 = vmatpush3.msra.mxu0 %v2033_v63  ;;  %v2351_v63 = vld [vmem:[#allocation7 + $0x210] sm:$0xff] }
 0x9d3   : > { %4366 = vmatpush3.msra.mxu1 %v1770_v2  ;;  %4470 = vmatprep.subr.mxu0 %v5178_v0  ;;  %v2031_v2 = vld [vmem:[#allocation8 + $0x1e8] sm:$0xff] }
 0x9d4   : > { %4367 = vmatprep.subr.mxu1 %v5178_v0  ;;  %4471 = vmatpush3.msra.mxu0 %v2032_v1  ;;  %v2350_v1 = vld [vmem:[#allocation7 + $0x208] sm:$0xff] }
 0x9d5   : > { %4368 = vmatpush3.msra.mxu1 %v1769_v3  ;;  %4472 = vmatprep.subr.mxu0 %v5178_v0  ;;  %v2028_v3 = vld [vmem:[#allocation8 + $0x1d0] sm:$0xff] }
 0x9d6   : > { %4369 = vmatprep.subr.mxu1 %v5178_v0  ;;  %4473 = vmatpush3.msra.mxu0 %v2031_v2  ;;  %v2349_v2 = vld [vmem:[#allocation7 + $0x200] sm:$0xff] }
 0x9d7   : > { %4370 = vmatpush3.msra.mxu1 %v1768_v4  ;;  %4474 = vmatprep.subr.mxu0 %v5178_v0  ;;  %v2027_v4 = vld [vmem:[#allocation8 + $0x1c8] sm:$0xff] }
 0x9d8   : > { %4371 = vmatprep.subr.mxu1 %v5178_v0  ;;  %4475 = vmatpush3.msra.mxu0 %v2030_v23  ;;  %v2451_v23 = vld [vmem:[#allocation5 + $0x278] sm:$0xff] }
 0x9d9   : > { %4372 = vmatpush3.msra.mxu1 %v1767_v5  ;;  %4476 = vmatprep.subr.mxu0 %v5178_v0  ;;  %v2026_v5 = vld [vmem:[#allocation8 + $0x1c0] sm:$0xff] }
 0x9da   : > { %4373 = vmatprep.subr.mxu1 %v5178_v0  ;;  %4477 = vmatpush3.msra.mxu0 %v2029_v27 }
 0x9db   : > { %4374 = vmatpush3.msra.mxu1 %v1766_v6  ;;  %4478 = vmatprep.subr.mxu0 %v5178_v0  ;;  %v2025_v6 = vld [vmem:[#allocation8 + $0x1b8] sm:$0xff] }
 0x9dc   : > { %4375 = vmatprep.subr.mxu1 %v5178_v0  ;;  %4479 = vmatpush3.msra.mxu0 %v2028_v3  ;;  %v2450_v3 = vld [vmem:[#allocation5 + $0x270] sm:$0xff] }
 0x9dd   : > { %4376 = vmatpush3.msra.mxu1 %v1765_v7  ;;  %4480 = vmatprep.subr.mxu0 %v5178_v0  ;;  %v2024_v7 = vld [vmem:[#allocation8 + $0x1b0] sm:$0xff] }
 0x9de   : > { %4377 = vmatprep.subr.mxu1 %v5178_v0  ;;  %4481 = vmatpush3.msra.mxu0 %v2027_v4 }
 0x9df   : > { %4378 = vmatpush3.msra.mxu1 %v1764_v8  ;;  %4482 = vmatprep.subr.mxu0 %v5178_v0  ;;  %v2023_v8 = vld [vmem:[#allocation8 + $0x1a8] sm:$0xff] }
 0x9e0   : > { %4379 = vmatprep.subr.mxu1 %v5178_v0  ;;  %4483 = vmatpush3.msra.mxu0 %v2026_v5  ;;  %v2449_v5 = vld [vmem:[#allocation5 + $0x268] sm:$0xff] }
 0x9e1   : > { %4380 = vmatpush3.msra.mxu1 %v1763_v9  ;;  %4484 = vmatprep.subr.mxu0 %v5178_v0  ;;  %v2022_v9 = vld [vmem:[#allocation8 + $0x1a0] sm:$0xff] }
 0x9e2   : > { %4381 = vmatprep.subr.mxu1 %v5178_v0  ;;  %4485 = vmatpush3.msra.mxu0 %v2025_v6  ;;  %v2448_v6 = vld [vmem:[#allocation5 + $0x260] sm:$0xff] }
 0x9e3   : > { %4382 = vmatpush3.msra.mxu1 %v1762_v10  ;;  %4486 = vmatprep.subr.mxu0 %v5178_v0  ;;  %v2021_v10 = vld [vmem:[#allocation8 + $0x198] sm:$0xff] }
 0x9e4   : > { %4383 = vmatprep.subr.mxu1 %v5178_v0  ;;  %4487 = vmatpush3.msra.mxu0 %v2024_v7  ;;  %v2447_v7 = vld [vmem:[#allocation5 + $0x258] sm:$0xff] }
 0x9e5   : > { %4384 = vmatpush3.msra.mxu1 %v1761_v11  ;;  %4488 = vmatprep.subr.mxu0 %v5178_v0  ;;  %v2020_v11 = vld [vmem:[#allocation8 + $0x190] sm:$0xff] }
 0x9e6   : > { %4385 = vmatprep.subr.mxu1 %v5178_v0  ;;  %4489 = vmatpush3.msra.mxu0 %v2023_v8  ;;  %v2446_v8 = vld [vmem:[#allocation5 + $0x250] sm:$0xff] }
 0x9e7   : > { %4386 = vmatpush3.msra.mxu1 %v1760_v12  ;;  %4490 = vmatprep.subr.mxu0 %v5178_v0  ;;  %v2019_v12 = vld [vmem:[#allocation8 + $0x188] sm:$0xff] }
 0x9e8   : > { %4387 = vmatprep.subr.mxu1 %v5178_v0  ;;  %4491 = vmatpush3.msra.mxu0 %v2022_v9  ;;  %v2445_v9 = vld [vmem:[#allocation5 + $0x248] sm:$0xff] }
 0x9e9   : > { %4388 = vmatpush3.msra.mxu1 %v1759_v13  ;;  %4492 = vmatprep.subr.mxu0 %v5178_v0  ;;  %v2018_v13 = vld [vmem:[#allocation8 + $0x180] sm:$0xff] }
 0x9ea   : > { %4389 = vmatprep.subr.mxu1 %v5178_v0  ;;  %4493 = vmatpush3.msra.mxu0 %v2021_v10  ;;  %v2444_v10 = vld [vmem:[#allocation5 + $0x240] sm:$0xff] }
 0x9eb   : > { %4390 = vmatpush3.msra.mxu1 %v1758_v14  ;;  %4494 = vmatprep.subr.mxu0 %v5178_v0 }
 0x9ec   : > { %4391 = vmatprep.subr.mxu1 %v5178_v0  ;;  %4495 = vmatpush3.msra.mxu0 %v2020_v11  ;;  %v2443_v11 = vld [vmem:[#allocation5 + $0x238] sm:$0xff] }
 0x9ed   : > { %4392 = vmatpush3.msra.mxu1 %v1757_v15  ;;  %4496 = vmatprep.subr.mxu0 %v5178_v0 }
 0x9ee   : > { %4393 = vmatprep.subr.mxu1 %v5178_v0  ;;  %4497 = vmatpush3.msra.mxu0 %v2019_v12  ;;  %v2442_v12 = vld [vmem:[#allocation5 + $0x230] sm:$0xff] }
 0x9ef   : > { %4394 = vmatpush3.msra.mxu1 %v1756_v16  ;;  %4498 = vmatprep.subr.mxu0 %v5178_v0 }
 0x9f0   : > { %4433 = vmatprep.subr.mxu1 %v5178_v0  ;;  %4499 = vmatpush3.msra.mxu0 %v2018_v13  ;;  %v2441_v13 = vld [vmem:[#allocation5 + $0x228] sm:$0xff] }
 0x9f1   : > { %4501 = vmatmul.mubr.f32.vlgmr.msra.gmra.mxu0 %v5649_v47  ;;  %4548 = vmatprep.subr.mxu0 %v5178_v0 }
 0x9f2   : > { %4580 = vmatprep.mubr.msk.f32.mxu0 %vm5179_vm0, %v5178_v0 }
 0xa90   : > { %v1751_v36 = vpop.f32.mrf.mxu1 }
 0xa91   : > { %4396 = vmatmul.mubr.f32.vlgmr.msra.gmra.mxu1 %v1751_v36  ;;  %v2271_v36 = vld [vmem:[#allocation10 + $0x1d0] sm:$0xff] }
 0xa92   : > { %4434 = vmatpush3.msra.mxu1 %v1946_v35  ;;  %v4362_v38 = vpop.f32.mrf.mxu1  ;;  %4465 = vmatprep.mubr.msk.f32.mxu1 %vm5179_vm0, %v5178_v0  ;;  %v2272_v35 = vld [vmem:[#allocation10 + $0x1d8] sm:$0xff] }
 0xa93   : > { %4435 = vmatprep.subr.mxu1 %v5178_v0  ;;  %v2269_v38 = vld [vmem:[#allocation10 + $0x1c0] sm:$0xff] }
 0xa94   : > { %4436 = vmatpush3.msra.mxu1 %v1945_v37  ;;  %v2270_v37 = vld [vmem:[#allocation10 + $0x1c8] sm:$0xff] }
 0xa95   : > { %4437 = vmatprep.subr.mxu1 %v5178_v0 }
 0xa96   : > { %4438 = vmatpush3.msra.mxu1 %v1944_v39  ;;  %v2268_v39 = vld [vmem:[#allocation10 + $0x1b8] sm:$0xff] }
 0xa97   : > { %4439 = vmatprep.subr.mxu1 %v5178_v0 }
 0xa98   : > { %4440 = vmatpush3.msra.mxu1 %v1943_v40  ;;  %v2267_v40 = vld [vmem:[#allocation10 + $0x1b0] sm:$0xff] }
 0xa99   : > { %4441 = vmatprep.subr.mxu1 %v5178_v0 }
 0xa9a   : > { %4442 = vmatpush3.msra.mxu1 %v1942_v41  ;;  %v2266_v41 = vld [vmem:[#allocation10 + $0x1a8] sm:$0xff] }
 0xa9b   : > { %4443 = vmatprep.subr.mxu1 %v5178_v0 }
 0xa9c   : > { %4444 = vmatpush3.msra.mxu1 %v1941_v42  ;;  %v2265_v42 = vld [vmem:[#allocation10 + $0x1a0] sm:$0xff] }
 0xa9d   : > { %4445 = vmatprep.subr.mxu1 %v5178_v0 }
 0xa9e   : > { %4446 = vmatpush3.msra.mxu1 %v1940_v43  ;;  %v2264_v43 = vld [vmem:[#allocation10 + $0x198] sm:$0xff] }
 0xa9f   : > { %4447 = vmatprep.subr.mxu1 %v5178_v0 }
 0xaa0   : > { %4448 = vmatpush3.msra.mxu1 %v1939_v44  ;;  %v2263_v44 = vld [vmem:[#allocation10 + $0x190] sm:$0xff] }
 0xaa1   : > { %4449 = vmatprep.subr.mxu1 %v5178_v0 }
 0xaa2   : > { %4450 = vmatpush3.msra.mxu1 %v1938_v45  ;;  %v2262_v45 = vld [vmem:[#allocation10 + $0x188] sm:$0xff] }
 0xaa3   : > { %4451 = vmatprep.subr.mxu1 %v5178_v0 }
 0xaa4   : > { %4452 = vmatpush3.msra.mxu1 %v1937_v46  ;;  %v2261_v46 = vld [vmem:[#allocation10 + $0x180] sm:$0xff] }
 0xaa5   : > { %4453 = vmatprep.subr.mxu1 %v5178_v0 }
 0xaa6   : > { %4454 = vmatpush3.msra.mxu1 %v1936_v48  ;;  %v2364_v48 = vld [vmem:[#allocation7 + $0x278] sm:$0xff] }
 0xaa7   : > { %4455 = vmatprep.subr.mxu1 %v5178_v0  ;;  %4549 = vmatpush3.msra.mxu0 %v2364_v48 }
 0xaa8   : > { %4456 = vmatpush3.msra.mxu1 %v1935_v49  ;;  %4550 = vmatprep.subr.mxu0 %v5178_v0  ;;  %v2363_v49 = vld [vmem:[#allocation7 + $0x270] sm:$0xff] }
 0xaa9   : > { %4457 = vmatprep.subr.mxu1 %v5178_v0  ;;  %4551 = vmatpush3.msra.mxu0 %v2363_v49 }
 0xaaa   : > { %4458 = vmatpush3.msra.mxu1 %v1934_v50  ;;  %4552 = vmatprep.subr.mxu0 %v5178_v0  ;;  %v2362_v50 = vld [vmem:[#allocation7 + $0x268] sm:$0xff] }
 0xaab   : > { %4459 = vmatprep.subr.mxu1 %v5178_v0  ;;  %4553 = vmatpush3.msra.mxu0 %v2362_v50 }
 0xaac   : > { %4460 = vmatpush3.msra.mxu1 %v1933_v51  ;;  %4554 = vmatprep.subr.mxu0 %v5178_v0  ;;  %v2361_v51 = vld [vmem:[#allocation7 + $0x260] sm:$0xff] }
 0xaad   : > { %4461 = vmatprep.subr.mxu1 %v5178_v0  ;;  %4555 = vmatpush3.msra.mxu0 %v2361_v51 }
 0xaae   : > { %4462 = vmatpush3.msra.mxu1 %v1932_v52  ;;  %4556 = vmatprep.subr.mxu0 %v5178_v0  ;;  %v2360_v52 = vld [vmem:[#allocation7 + $0x258] sm:$0xff] }
 0xaaf   : > { %4463 = vmatprep.subr.mxu1 %v5178_v0  ;;  %4557 = vmatpush3.msra.mxu0 %v2360_v52 }
 0xab0   : > { %4464 = vmatpush3.msra.mxu1 %v1931_v53  ;;  %4558 = vmatprep.subr.mxu0 %v5178_v0  ;;  %v2359_v53 = vld [vmem:[#allocation7 + $0x250] sm:$0xff] }
 0xab1   : > { %4466 = vmatmul.mubr.f32.vlgmr.msra.gmra.mxu1 %v5649_v47  ;;  %4503 = vmatprep.subr.mxu1 %v5178_v0  ;;  %v2100_v25 = vpop.f32.mrf.mxu0 }
 0xab2   : > { %4505 = vmatprep.mubr.msk.f32.mxu1 %vm5179_vm0, %v5178_v0  ;;  %4559 = vmatpush3.msra.mxu0 %v2359_v53 }
 0xab3   : > { %v4502_v26 = vpop.f32.mrf.mxu0  ;;  %4560 = vmatprep.subr.mxu0 %v5178_v0 }
 0xb51   : > { %v1838_v57 = vpop.f32.mrf.mxu1 }
 0xb52   : > { %v5721_v59 = vadd.f32 %v1838_v57, %v1335_v56  ;;  %v2356_v56 = vld [vmem:[#allocation7 + $0x238] sm:$0xff]  ;;  %v2355_v57 = vld [vmem:[#allocation7 + $0x230] sm:$0xff] }
 0xb53   : > { %v4397_v60 = vpop.f32.mrf.mxu1 }
 0xb54   : > { %v2354_v60 = vld [vmem:[#allocation7 + $0x228] sm:$0xff] }
 0xb71   : > { %v2013_v61 = vpop.f32.mrf.mxu1 }
 0xb72   : > { %4504 = vmatpush3.xpose.msra.mxu1 %v2013_v61  ;;  %v2353_v61 = vld [vmem:[#allocation7 + $0x220] sm:$0xff] }
 0xb73   : > { %v4467_v62 = vpop.f32.mrf.mxu1  ;;  %4508 = vmatprep.subr.mxu1 %v5178_v0 }
 0xb74   : > { %v2352_v62 = vld [vmem:[#allocation7 + $0x218] sm:$0xff] }
 0xb75   : > { %4506 = vmatmul.mubr.f32.vlgmr.msra.gmra.mxu1 %v1926_v54  ;;  %v2358_v54 = vld [vmem:[#allocation7 + $0x248] sm:$0xff] }
 0xb76   : > { %4510 = vmatprep.mubr.msk.f32.mxu1 %vm5179_vm0, %v5178_v0  ;;  %4509 = vmatpush3.msra.mxu1 %v2100_v25 }
 0xb77   : > { %4513 = vmatprep.subr.mxu1 %v5178_v0  ;;  %4561 = vmatpush3.msra.mxu0 %v2358_v54 }
 0xb78   : > { %4562 = vmatprep.subr.mxu0 %v5178_v0 }
 0xb79   : > { %4563 = vmatpush3.msra.mxu0 %v2357_v55 }
 0xb7a   : > { %4564 = vmatprep.subr.mxu0 %v5178_v0 }
 0xb7b   : > { %4565 = vmatpush3.msra.mxu0 %v2356_v56 }
 0xb7c   : > { %4566 = vmatprep.subr.mxu0 %v5178_v0 }
 0xb7d   : > { %4567 = vmatpush3.msra.mxu0 %v2355_v57 }
 0xb7e   : > { %4568 = vmatprep.subr.mxu0 %v5178_v0 }
 0xb7f   : > { %4569 = vmatpush3.msra.mxu0 %v2354_v60  ;;  %v2781_v60 = vld [vmem:[#allocation10 + $0x278] sm:$0xff] }
 0xb80   : > { %4570 = vmatprep.subr.mxu0 %v5178_v0 }
 0xb81   : > { %4571 = vmatpush3.msra.mxu0 %v2353_v61  ;;  %v2780_v61 = vld [vmem:[#allocation10 + $0x270] sm:$0xff] }
 0xb82   : > { %4572 = vmatprep.subr.mxu0 %v5178_v0 }
 0xb83   : > { %4573 = vmatpush3.msra.mxu0 %v2352_v62  ;;  %v2779_v62 = vld [vmem:[#allocation10 + $0x268] sm:$0xff] }
 0xb84   : > { %4574 = vmatprep.subr.mxu0 %v5178_v0 }
 0xb85   : > { %4575 = vmatpush3.msra.mxu0 %v2351_v63  ;;  %v2778_v63 = vld [vmem:[#allocation10 + $0x260] sm:$0xff] }
 0xb86   : > { %4576 = vmatprep.subr.mxu0 %v5178_v0 }
 0xb87   : > { %4577 = vmatpush3.msra.mxu0 %v2350_v1  ;;  %v2777_v1 = vld [vmem:[#allocation10 + $0x258] sm:$0xff] }
 0xb88   : > { %4578 = vmatprep.subr.mxu0 %v5178_v0 }
 0xb89   : > { %4579 = vmatpush3.msra.mxu0 %v2349_v2  ;;  %v2776_v2 = vld [vmem:[#allocation10 + $0x250] sm:$0xff] }
 0xb8a   : > { %4581 = vmatmul.mubr.f32.vlgmr.msra.gmra.mxu0 %v5649_v47  ;;  %4618 = vmatprep.subr.mxu0 %v5178_v0 }
 0xb8b   : > { %4650 = vmatprep.mubr.msk.f32.mxu0 %vm5179_vm0, %v5178_v0 }
 0xc35   : > { %v2170_v14 = vpop.f32.mrf.mxu1 }
 0xc36   : > { %v2174_v15 = vmul.f32 0.4082483, %v2170_v14  ;;  %v2440_v14 = vld [vmem:[#allocation5 + $0x220] sm:$0xff] }
 0xc37   : > { %v4507_v16 = vpop.f32.mrf.mxu1 }
 0xc38   : > { %v2175_v17 = vsel %vm5469_vm3, %v2174_v15, -1e+30  ;;  %v2439_v15 = vld [vmem:[#allocation5 + $0x218] sm:$0xff]  ;;  %v2438_v16 = vld [vmem:[#allocation5 + $0x210] sm:$0xff] }
 0xc39   : > { %v2176_v18 = vsel %vm663_vm4, %v2175_v17, -inf }
 0xc3a   : > { %2177 = vmax.xlane.f32.xlu0 %v2176_v18  ;;  %v2436_v18 = vld [vmem:[#allocation5 + $0x200] sm:$0xff] }
 0xcc3   : > { %v2178_v19 = vpop.xlane.xlu0 %2177 }
 0xcc4   : > { %v2179_v20 = vsub.f32 %v2175_v17, %v2178_v19  ;;  %v2437_v17 = vld [vmem:[#allocation5 + $0x208] sm:$0xff]  ;;  %v2431_v19 = vpop.f32.mrf.mxu0 }
 0xcc6   : > { %v2180_v21 = vmul.f32 1.442695, %v2179_v20  ;;  %v4582_v20 = vpop.f32.mrf.mxu0 }
 0xcc7   : > { %v2860_v20 = vld [vmem:[#allocation7 + $0x2b0] sm:$0xff] }
 0xcc8   : > { %4951 = vpow2.f32 %v2180_v21 }
 0xcd5   : > { %v4952_v22 = vpop.eup %4951 }
 0xcd6   : > { %v2182_v24 = vsel %vm663_vm4, %v4952_v22, 0.0 }
 0xcd7   : > { %2183 = vadd.xlane.f32.xlu1 %v2182_v24 }
 0xd60   : > { %v2184_v28 = vpop.xlane.xlu1 %2183 }
 0xd61   : > { %4953 = vrcp.f32 %v2184_v28  ;;  %v2538_v28 = vld [vmem:[#allocation8 + $0x278] sm:$0xff] }
 0xd62   : > { %4619 = vmatpush3.msra.mxu0 %v2538_v28  ;;  %v2855_v28 = vld [vmem:[#allocation7 + $0x288] sm:$0xff] }
 0xd63   : > { %4620 = vmatprep.subr.mxu0 %v5178_v0 }
 0xd6e   : > { %v4954_v29 = vpop.eup %4953 }
 0xd6f   : > { %v2186_v30 = vmul.f32 %v4954_v29, %v4952_v22  ;;  %v2537_v29 = vld [vmem:[#allocation8 + $0x270] sm:$0xff] }
 0xd70   : > { %4621 = vmatpush3.msra.mxu0 %v2537_v29  ;;  %v2854_v29 = vld [vmem:[#allocation7 + $0x280] sm:$0xff] }
 0xd71   : > { %4511 = vmatmul.mubr.msk.f32.vlgmr.msra.gmra.mxu1 %vm663_vm4, %v2186_v30  ;;  %v2536_v30 = vld [vmem:[#allocation8 + $0x268] sm:$0xff]  ;;  %4622 = vmatprep.subr.mxu0 %v5178_v0 }
 0xd72   : > { %4514 = vmatpush3.msra.mxu1 %v2276_v33  ;;  %4545 = vmatprep.mubr.msk.f32.mxu1 %vm5179_vm0, %v5178_v0  ;;  %v2534_v33 = vld [vmem:[#allocation8 + $0x258] sm:$0xff] }
 0xd73   : > { %4515 = vmatprep.subr.mxu1 %v5178_v0  ;;  %4623 = vmatpush3.msra.mxu0 %v2536_v30  ;;  %v5874_v30 = vld [vmem:[%s5386_s1] sm:$0xff] }
 0xd74   : > { %4516 = vmatpush3.msra.mxu1 %v2275_v31  ;;  %4624 = vmatprep.subr.mxu0 %v5178_v0  ;;  %v2533_v31 = vld [vmem:[#allocation8 + $0x250] sm:$0xff] }
 0xd75   : > { %4517 = vmatprep.subr.mxu1 %v5178_v0 }
 0xd76   : > { %4518 = vmatpush3.msra.mxu1 %v2274_v32  ;;  %v2532_v32 = vld [vmem:[#allocation8 + $0x248] sm:$0xff] }
 0xd77   : > { %4519 = vmatprep.subr.mxu1 %v5178_v0 }
 0xd78   : > { %4520 = vmatpush3.msra.mxu1 %v2273_v34  ;;  %v2531_v34 = vld [vmem:[#allocation8 + $0x240] sm:$0xff] }
 0xd79   : > { %4521 = vmatprep.subr.mxu1 %v5178_v0 }
 0xd7a   : > { %4522 = vmatpush3.msra.mxu1 %v2272_v35  ;;  %v2530_v35 = vld [vmem:[#allocation8 + $0x238] sm:$0xff] }
 0xd7b   : > { %4523 = vmatprep.subr.mxu1 %v5178_v0 }
 0xd7c   : > { %4524 = vmatpush3.msra.mxu1 %v2271_v36  ;;  %v2529_v36 = vld [vmem:[#allocation8 + $0x230] sm:$0xff] }
 0xd7d   : > { %4525 = vmatprep.subr.mxu1 %v5178_v0 }
 0xd7e   : > { %4526 = vmatpush3.msra.mxu1 %v2270_v37  ;;  %v2528_v37 = vld [vmem:[#allocation8 + $0x228] sm:$0xff] }
 0xd7f   : > { %4527 = vmatprep.subr.mxu1 %v5178_v0 }
 0xd80   : > { %4528 = vmatpush3.msra.mxu1 %v2269_v38  ;;  %v2527_v38 = vld [vmem:[#allocation8 + $0x220] sm:$0xff] }
 0xd81   : > { %4529 = vmatprep.subr.mxu1 %v5178_v0 }
 0xd82   : > { %4530 = vmatpush3.msra.mxu1 %v2268_v39  ;;  %v2526_v39 = vld [vmem:[#allocation8 + $0x218] sm:$0xff] }
 0xd83   : > { %4531 = vmatprep.subr.mxu1 %v5178_v0 }
 0xd84   : > { %4532 = vmatpush3.msra.mxu1 %v2267_v40  ;;  %v2525_v40 = vld [vmem:[#allocation8 + $0x210] sm:$0xff] }
 0xd85   : > { %4533 = vmatprep.subr.mxu1 %v5178_v0 }
 0xd86   : > { %4534 = vmatpush3.msra.mxu1 %v2266_v41  ;;  %v2524_v41 = vld [vmem:[#allocation8 + $0x208] sm:$0xff] }
 0xd87   : > { %4535 = vmatprep.subr.mxu1 %v5178_v0 }
 0xd88   : > { %4536 = vmatpush3.msra.mxu1 %v2265_v42  ;;  %v2523_v42 = vld [vmem:[#allocation8 + $0x200] sm:$0xff] }
 0xd89   : > { %4537 = vmatprep.subr.mxu1 %v5178_v0 }
 0xd8a   : > { %4538 = vmatpush3.msra.mxu1 %v2264_v43 }
 0xd8b   : > { %4539 = vmatprep.subr.mxu1 %v5178_v0 }
 0xd8c   : > { %4540 = vmatpush3.msra.mxu1 %v2263_v44 }
 0xd8d   : > { %4541 = vmatprep.subr.mxu1 %v5178_v0 }
 0xd8e   : > { %4542 = vmatpush3.msra.mxu1 %v2262_v45 }
 0xd8f   : > { %4543 = vmatprep.subr.mxu1 %v5178_v0 }
 0xd90   : > { %4544 = vmatpush3.msra.mxu1 %v2261_v46 }
 0xd91   : > { %4583 = vmatprep.subr.mxu1 %v5178_v0 }
 0xe31   : > { %v2256_v27 = vpop.f32.mrf.mxu1 }
 0xe32   : > { %4546 = vmatmul.mubr.f32.vlgmr.msra.gmra.mxu1 %v2256_v27  ;;  %v2774_v27 = vld [vmem:[#allocation10 + $0x240] sm:$0xff] }
 0xe33   : > { %4584 = vmatpush3.msra.mxu1 %v2451_v23  ;;  %v4512_v4 = vpop.f32.mrf.mxu1  ;;  %4615 = vmatprep.mubr.msk.f32.mxu1 %vm5179_vm0, %v5178_v0  ;;  %v2775_v23 = vld [vmem:[#allocation10 + $0x248] sm:$0xff] }
 0xe34   : > { %4585 = vmatprep.subr.mxu1 %v5178_v0  ;;  %v2772_v4 = vld [vmem:[#allocation10 + $0x230] sm:$0xff] }
 0xe35   : > { %4586 = vmatpush3.msra.mxu1 %v2450_v3  ;;  %v2773_v3 = vld [vmem:[#allocation10 + $0x238] sm:$0xff] }
 0xe36   : > { %4587 = vmatprep.subr.mxu1 %v5178_v0 }
 0xe37   : > { %4588 = vmatpush3.msra.mxu1 %v2449_v5  ;;  %v2771_v5 = vld [vmem:[#allocation10 + $0x228] sm:$0xff] }
 0xe38   : > { %4589 = vmatprep.subr.mxu1 %v5178_v0 }
 0xe39   : > { %4590 = vmatpush3.msra.mxu1 %v2448_v6  ;;  %v2770_v6 = vld [vmem:[#allocation10 + $0x220] sm:$0xff] }
 0xe3a   : > { %4591 = vmatprep.subr.mxu1 %v5178_v0 }
 0xe3b   : > { %4592 = vmatpush3.msra.mxu1 %v2447_v7  ;;  %v2769_v7 = vld [vmem:[#allocation10 + $0x218] sm:$0xff] }
 0xe3c   : > { %4593 = vmatprep.subr.mxu1 %v5178_v0 }
 0xe3d   : > { %4594 = vmatpush3.msra.mxu1 %v2446_v8  ;;  %v2768_v8 = vld [vmem:[#allocation10 + $0x210] sm:$0xff] }
 0xe3e   : > { %4595 = vmatprep.subr.mxu1 %v5178_v0 }
 0xe3f   : > { %4596 = vmatpush3.msra.mxu1 %v2445_v9  ;;  %v2767_v9 = vld [vmem:[#allocation10 + $0x208] sm:$0xff] }
 0xe40   : > { %4597 = vmatprep.subr.mxu1 %v5178_v0 }
 0xe41   : > { %4598 = vmatpush3.msra.mxu1 %v2444_v10  ;;  %v2766_v10 = vld [vmem:[#allocation10 + $0x200] sm:$0xff] }
 0xe42   : > { %4599 = vmatprep.subr.mxu1 %v5178_v0 }
 0xe43   : > { %4600 = vmatpush3.msra.mxu1 %v2443_v11  ;;  %v2869_v11 = vld [vmem:[#allocation7 + $0x2f8] sm:$0xff] }
 0xe44   : > { %4601 = vmatprep.subr.mxu1 %v5178_v0 }
 0xe45   : > { %4602 = vmatpush3.msra.mxu1 %v2442_v12  ;;  %v2868_v12 = vld [vmem:[#allocation7 + $0x2f0] sm:$0xff] }
 0xe46   : > { %4603 = vmatprep.subr.mxu1 %v5178_v0 }
 0xe47   : > { %4604 = vmatpush3.msra.mxu1 %v2441_v13  ;;  %v2867_v13 = vld [vmem:[#allocation7 + $0x2e8] sm:$0xff] }
 0xe48   : > { %4605 = vmatprep.subr.mxu1 %v5178_v0 }
 0xe49   : > { %4606 = vmatpush3.msra.mxu1 %v2440_v14  ;;  %v2866_v14 = vld [vmem:[#allocation7 + $0x2e0] sm:$0xff] }
 0xe4a   : > { %4607 = vmatprep.subr.mxu1 %v5178_v0 }
 0xe4b   : > { %4608 = vmatpush3.msra.mxu1 %v2439_v15  ;;  %v2865_v15 = vld [vmem:[#allocation7 + $0x2d8] sm:$0xff] }
 0xe4c   : > { %4609 = vmatprep.subr.mxu1 %v5178_v0 }
 0xe4d   : > { %4610 = vmatpush3.msra.mxu1 %v2438_v16  ;;  %v2864_v16 = vld [vmem:[#allocation7 + $0x2d0] sm:$0xff] }
 0xe4e   : > { %4611 = vmatprep.subr.mxu1 %v5178_v0 }
 0xe4f   : > { %4612 = vmatpush3.msra.mxu1 %v2437_v17  ;;  %v2863_v17 = vld [vmem:[#allocation7 + $0x2c8] sm:$0xff] }
 0xe50   : > { %4613 = vmatprep.subr.mxu1 %v5178_v0 }
 0xe51   : > { %4614 = vmatpush3.msra.mxu1 %v2436_v18  ;;  %v2862_v18 = vld [vmem:[#allocation7 + $0x2c0] sm:$0xff] }
 0xe52   : > { %4616 = vmatmul.mubr.f32.vlgmr.msra.gmra.mxu1 %v5649_v47  ;;  %4653 = vmatprep.subr.mxu1 %v5178_v0 }
 0xe53   : > { %4655 = vmatprep.mubr.msk.f32.mxu1 %vm5179_vm0, %v5178_v0 }
 0xef2   : > { %v2343_v21 = vpop.f32.mrf.mxu1 }
 0xef3   : > { %v5810_v22 = vadd.f32 %v2343_v21, %v5721_v59  ;;  %v2535_v59 = vld [vmem:[#allocation8 + $0x260] sm:$0xff]  ;;  %v2859_v21 = vld [vmem:[#allocation7 + $0x2a8] sm:$0xff] }
 0xef4   : > { %v4547_v24 = vpop.f32.mrf.mxu1  ;;  %4625 = vmatpush3.msra.mxu0 %v2535_v59  ;;  %v2956_v59 = vld [vmem:[#allocation5 + $0x2f8] sm:$0xff] }
 0xef5   : > { %4626 = vmatprep.subr.mxu0 %v5178_v0  ;;  %v2858_v24 = vld [vmem:[#allocation7 + $0x2a0] sm:$0xff] }
 0xef6   : > { %4627 = vmatpush3.msra.mxu0 %v2534_v33 }
 0xef7   : > { %4628 = vmatprep.subr.mxu0 %v5178_v0 }
 0xef8   : > { %4629 = vmatpush3.msra.mxu0 %v2533_v31  ;;  %v2955_v31 = vld [vmem:[#allocation5 + $0x2f0] sm:$0xff] }
 0xef9   : > { %4630 = vmatprep.subr.mxu0 %v5178_v0 }
 0xefa   : > { %4631 = vmatpush3.msra.mxu0 %v2532_v32 }
 0xefb   : > { %4632 = vmatprep.subr.mxu0 %v5178_v0 }
 0xefc   : > { %4633 = vmatpush3.msra.mxu0 %v2531_v34  ;;  %v2954_v34 = vld [vmem:[#allocation5 + $0x2e8] sm:$0xff] }
 0xefd   : > { %4634 = vmatprep.subr.mxu0 %v5178_v0 }
 0xefe   : > { %4635 = vmatpush3.msra.mxu0 %v2530_v35  ;;  %v2953_v35 = vld [vmem:[#allocation5 + $0x2e0] sm:$0xff] }
 0xeff   : > { %4636 = vmatprep.subr.mxu0 %v5178_v0 }
 0xf00   : > { %4637 = vmatpush3.msra.mxu0 %v2529_v36  ;;  %v2952_v36 = vld [vmem:[#allocation5 + $0x2d8] sm:$0xff] }
 0xf01   : > { %4638 = vmatprep.subr.mxu0 %v5178_v0 }
 0xf02   : > { %4639 = vmatpush3.msra.mxu0 %v2528_v37  ;;  %v2951_v37 = vld [vmem:[#allocation5 + $0x2d0] sm:$0xff] }
 0xf03   : > { %4640 = vmatprep.subr.mxu0 %v5178_v0 }
 0xf04   : > { %4641 = vmatpush3.msra.mxu0 %v2527_v38  ;;  %v2950_v38 = vld [vmem:[#allocation5 + $0x2c8] sm:$0xff] }
 0xf05   : > { %4642 = vmatprep.subr.mxu0 %v5178_v0 }
 0xf06   : > { %4643 = vmatpush3.msra.mxu0 %v2526_v39  ;;  %v2949_v39 = vld [vmem:[#allocation5 + $0x2c0] sm:$0xff] }
 0xf07   : > { %4644 = vmatprep.subr.mxu0 %v5178_v0 }
 0xf08   : > { %4645 = vmatpush3.msra.mxu0 %v2525_v40  ;;  %v2948_v40 = vld [vmem:[#allocation5 + $0x2b8] sm:$0xff] }
 0xf09   : > { %4646 = vmatprep.subr.mxu0 %v5178_v0 }
 0xf0a   : > { %4647 = vmatpush3.msra.mxu0 %v2524_v41  ;;  %v2947_v41 = vld [vmem:[#allocation5 + $0x2b0] sm:$0xff] }
 0xf0b   : > { %4648 = vmatprep.subr.mxu0 %v5178_v0 }
 0xf0c   : > { %4649 = vmatpush3.msra.mxu0 %v2523_v42  ;;  %v2946_v42 = vld [vmem:[#allocation5 + $0x2a8] sm:$0xff] }
 0xf0d   : > { %4651 = vmatmul.mubr.f32.vlgmr.msra.gmra.mxu0 %v5649_v47  ;;  %4698 = vmatprep.subr.mxu0 %v5178_v0 }
 0xf0e   : > { %4730 = vmatprep.mubr.msk.f32.mxu0 %vm5179_vm0, %v5178_v0  ;;  %4699 = vmatpush3.msra.mxu0 %v2869_v11 }
 0xf0f   : > { %4700 = vmatprep.subr.mxu0 %v5178_v0 }
 0xf10   : > { %4701 = vmatpush3.msra.mxu0 %v2868_v12 }
 0xf11   : > { %4702 = vmatprep.subr.mxu0 %v5178_v0 }
 0xf12   : > { %v2518_v25 = vpop.f32.mrf.mxu1  ;;  %4703 = vmatpush3.msra.mxu0 %v2867_v13 }
 0xf13   : > { %4654 = vmatpush3.xpose.msra.mxu1 %v2518_v25  ;;  %4704 = vmatprep.subr.mxu0 %v5178_v0  ;;  %v2857_v25 = vld [vmem:[#allocation7 + $0x298] sm:$0xff] }
 0xf14   : > { %v4617_v26 = vpop.f32.mrf.mxu1  ;;  %4658 = vmatprep.subr.mxu1 %v5178_v0  ;;  %4705 = vmatpush3.msra.mxu0 %v2866_v14 }
 0xf15   : > { %4706 = vmatprep.subr.mxu0 %v5178_v0  ;;  %v2856_v26 = vld [vmem:[#allocation7 + $0x290] sm:$0xff] }
 0xf16   : > { %4656 = vmatmul.mubr.f32.vlgmr.msra.gmra.mxu1 %v2431_v19  ;;  %4707 = vmatpush3.msra.mxu0 %v2865_v15  ;;  %v2861_v19 = vld [vmem:[#allocation7 + $0x2b8] sm:$0xff] }
 0xf17   : > { %4660 = vmatprep.mubr.msk.f32.mxu1 %vm5179_vm0, %v5178_v0  ;;  %4708 = vmatprep.subr.mxu0 %v5178_v0 }
 0xf18   : > { %4709 = vmatpush3.msra.mxu0 %v2864_v16 }
 0xf19   : > { %4710 = vmatprep.subr.mxu0 %v5178_v0 }
 0xf1a   : > { %4711 = vmatpush3.msra.mxu0 %v2863_v17 }
 0xf1b   : > { %4712 = vmatprep.subr.mxu0 %v5178_v0 }
 0xf1c   : > { %4713 = vmatpush3.msra.mxu0 %v2862_v18 }
 0xf1d   : > { %4714 = vmatprep.subr.mxu0 %v5178_v0 }
 0xf1e   : > { %4715 = vmatpush3.msra.mxu0 %v2861_v19  ;;  %v3286_v19 = vld [vmem:[#allocation10 + $0x2f8] sm:$0xff] }
 0xf1f   : > { %4716 = vmatprep.subr.mxu0 %v5178_v0 }
 0xf20   : > { %4717 = vmatpush3.msra.mxu0 %v2860_v20  ;;  %v3285_v20 = vld [vmem:[#allocation10 + $0x2f0] sm:$0xff] }
 0xf21   : > { %4718 = vmatprep.subr.mxu0 %v5178_v0 }
 0xf22   : > { %4719 = vmatpush3.msra.mxu0 %v2859_v21  ;;  %v3283_v21 = vld [vmem:[#allocation10 + $0x2e0] sm:$0xff] }
 0xf23   : > { %4720 = vmatprep.subr.mxu0 %v5178_v0 }
 0xf24   : > { %4721 = vmatpush3.msra.mxu0 %v2858_v24  ;;  %v3282_v24 = vld [vmem:[#allocation10 + $0x2d8] sm:$0xff] }
 0xf25   : > { %4722 = vmatprep.subr.mxu0 %v5178_v0 }
 0xf26   : > { %4723 = vmatpush3.msra.mxu0 %v2857_v25  ;;  %v3281_v25 = vld [vmem:[#allocation10 + $0x2d0] sm:$0xff] }
 0xf27   : > { %4724 = vmatprep.subr.mxu0 %v5178_v0 }
 0xf28   : > { %4725 = vmatpush3.msra.mxu0 %v2856_v26  ;;  %v3280_v26 = vld [vmem:[#allocation10 + $0x2c8] sm:$0xff] }
 0xf29   : > { %4726 = vmatprep.subr.mxu0 %v5178_v0 }
 0xf2a   : > { %4727 = vmatpush3.msra.mxu0 %v2855_v28  ;;  %v3279_v28 = vld [vmem:[#allocation10 + $0x2c0] sm:$0xff] }
 0xf2b   : > { %4728 = vmatprep.subr.mxu0 %v5178_v0 }
 0xf2c   : > { %4729 = vmatpush3.msra.mxu0 %v2854_v29  ;;  %v3278_v29 = vld [vmem:[#allocation10 + $0x2b8] sm:$0xff] }
 0xf2d   : > { %4731 = vmatmul.mubr.f32.vlgmr.msra.gmra.mxu0 %v5874_v30  ;;  %4768 = vmatprep.subr.mxu0 %v5178_v0 }
 0xf2e   : > { %4800 = vmatprep.mubr.msk.f32.mxu0 %vm5179_vm0, %v5178_v0 }
 0xfcd   : > { %v2605_v53 = vpop.f32.mrf.mxu0 }
 0xfce   : > { %4659 = vmatpush3.msra.mxu1 %v2605_v53 }
 0xfcf   : > { %v4652_v54 = vpop.f32.mrf.mxu0  ;;  %4663 = vmatprep.subr.mxu1 %v5178_v0 }
 0xfd6   : > { %v2675_v43 = vpop.f32.mrf.mxu1 }
 0xfd7   : > { %v2679_v44 = vmul.f32 0.4082483, %v2675_v43  ;;  %v2945_v43 = vld [vmem:[#allocation5 + $0x2a0] sm:$0xff] }
 0xfd8   : > { %v4657_v45 = vpop.f32.mrf.mxu1 }
 0xfd9   : > { %v2680_v46 = vsel %vm5469_vm3, %v2679_v44, -1e+30  ;;  %v2944_v44 = vld [vmem:[#allocation5 + $0x298] sm:$0xff]  ;;  %v2943_v45 = vld [vmem:[#allocation5 + $0x290] sm:$0xff] }
 0xfda   : > { %v2681_v48 = vsel %vm663_vm4, %v2680_v46, -inf }
 0xfdb   : > { %2682 = vmax.xlane.f32.xlu0 %v2681_v48  ;;  %v2941_v48 = vld [vmem:[#allocation5 + $0x280] sm:$0xff] }
0x1064   : > { %v2683_v49 = vpop.xlane.xlu0 %2682 }
0x1065   : > { %v2684_v50 = vsub.f32 %v2680_v46, %v2683_v49  ;;  %v2942_v46 = vld [vmem:[#allocation5 + $0x288] sm:$0xff]  ;;  %v2936_v49 = vpop.f32.mrf.mxu0 }
0x1067   : > { %v2685_v51 = vmul.f32 1.442695, %v2684_v50  ;;  %v4732_v50 = vpop.f32.mrf.mxu0 }
0x1069   : > { %4955 = vpow2.f32 %v2685_v51 }
0x1076   : > { %v4956_v52 = vpop.eup %4955 }
0x1077   : > { %v2687_v47 = vsel %vm663_vm4, %v4956_v52, 0.0 }
0x1078   : > { %2688 = vadd.xlane.f32.xlu1 %v2687_v47 }
0x1101   : > { %v2689_v55 = vpop.xlane.xlu1 %2688 }
0x1102   : > { %4957 = vrcp.f32 %v2689_v55  ;;  %v3043_v55 = vld [vmem:[#allocation8 + $0x2f8] sm:$0xff] }
0x1103   : > { %4769 = vmatpush3.msra.mxu0 %v3043_v55 }
0x1104   : > { %4770 = vmatprep.subr.mxu0 %v5178_v0 }
0x110f   : > { %v4958_v56 = vpop.eup %4957 }
0x1110   : > { %v2691_v57 = vmul.f32 %v4958_v56, %v4956_v52  ;;  %v3042_v56 = vld [vmem:[#allocation8 + $0x2f0] sm:$0xff] }
0x1111   : > { %4771 = vmatpush3.msra.mxu0 %v3042_v56 }
0x1112   : > { %4661 = vmatmul.mubr.msk.f32.vlgmr.msra.gmra.mxu1 %vm663_vm4, %v2691_v57  ;;  %v3041_v57 = vld [vmem:[#allocation8 + $0x2e8] sm:$0xff]  ;;  %4772 = vmatprep.subr.mxu0 %v5178_v0 }
0x1113   : > { %4664 = vmatpush3.msra.mxu1 %v2781_v60  ;;  %4695 = vmatprep.mubr.msk.f32.mxu1 %vm5179_vm0, %v5178_v0  ;;  %v3039_v60 = vld [vmem:[#allocation8 + $0x2d8] sm:$0xff] }
0x1114   : > { %4665 = vmatprep.subr.mxu1 %v5178_v0  ;;  %4773 = vmatpush3.msra.mxu0 %v3041_v57 }
0x1115   : > { %4666 = vmatpush3.msra.mxu1 %v2780_v61  ;;  %4774 = vmatprep.subr.mxu0 %v5178_v0  ;;  %v3038_v61 = vld [vmem:[#allocation8 + $0x2d0] sm:$0xff] }
0x1116   : > { %4667 = vmatprep.subr.mxu1 %v5178_v0 }
0x1117   : > { %4668 = vmatpush3.msra.mxu1 %v2779_v62  ;;  %v3037_v62 = vld [vmem:[#allocation8 + $0x2c8] sm:$0xff] }
0x1118   : > { %4669 = vmatprep.subr.mxu1 %v5178_v0 }
0x1119   : > { %4670 = vmatpush3.msra.mxu1 %v2778_v63  ;;  %v3036_v63 = vld [vmem:[#allocation8 + $0x2c0] sm:$0xff] }
0x111a   : > { %4671 = vmatprep.subr.mxu1 %v5178_v0 }
0x111b   : > { %4672 = vmatpush3.msra.mxu1 %v2777_v1  ;;  %v3035_v1 = vld [vmem:[#allocation8 + $0x2b8] sm:$0xff] }
0x111c   : > { %4673 = vmatprep.subr.mxu1 %v5178_v0 }
0x111d   : > { %4674 = vmatpush3.msra.mxu1 %v2776_v2  ;;  %v3034_v2 = vld [vmem:[#allocation8 + $0x2b0] sm:$0xff] }
0x111e   : > { %4675 = vmatprep.subr.mxu1 %v5178_v0 }
0x111f   : > { %4676 = vmatpush3.msra.mxu1 %v2775_v23  ;;  %v3033_v23 = vld [vmem:[#allocation8 + $0x2a8] sm:$0xff] }
0x1120   : > { %4677 = vmatprep.subr.mxu1 %v5178_v0 }
0x1121   : > { %4678 = vmatpush3.msra.mxu1 %v2774_v27  ;;  %v3032_v27 = vld [vmem:[#allocation8 + $0x2a0] sm:$0xff] }
0x1122   : > { %4679 = vmatprep.subr.mxu1 %v5178_v0 }
0x1123   : > { %4680 = vmatpush3.msra.mxu1 %v2773_v3  ;;  %v3031_v3 = vld [vmem:[#allocation8 + $0x298] sm:$0xff] }
0x1124   : > { %4681 = vmatprep.subr.mxu1 %v5178_v0 }
0x1125   : > { %4682 = vmatpush3.msra.mxu1 %v2772_v4  ;;  %v3030_v4 = vld [vmem:[#allocation8 + $0x290] sm:$0xff] }
0x1126   : > { %4683 = vmatprep.subr.mxu1 %v5178_v0 }
0x1127   : > { %4684 = vmatpush3.msra.mxu1 %v2771_v5  ;;  %v3029_v5 = vld [vmem:[#allocation8 + $0x288] sm:$0xff] }
0x1128   : > { %4685 = vmatprep.subr.mxu1 %v5178_v0 }
0x1129   : > { %4686 = vmatpush3.msra.mxu1 %v2770_v6  ;;  %v3028_v6 = vld [vmem:[#allocation8 + $0x280] sm:$0xff] }
0x112a   : > { %4687 = vmatprep.subr.mxu1 %v5178_v0 }
0x112b   : > { %4688 = vmatpush3.msra.mxu1 %v2769_v7 }
0x112c   : > { %4689 = vmatprep.subr.mxu1 %v5178_v0 }
0x112d   : > { %4690 = vmatpush3.msra.mxu1 %v2768_v8 }
0x112e   : > { %4691 = vmatprep.subr.mxu1 %v5178_v0 }
0x112f   : > { %4692 = vmatpush3.msra.mxu1 %v2767_v9 }
0x1130   : > { %4693 = vmatprep.subr.mxu1 %v5178_v0 }
0x1131   : > { %4694 = vmatpush3.msra.mxu1 %v2766_v10 }
0x1132   : > { %4733 = vmatprep.subr.mxu1 %v5178_v0 }
0x11d2   : > { %v2761_v33 = vpop.f32.mrf.mxu1 }
0x11d3   : > { %4696 = vmatmul.mubr.f32.vlgmr.msra.gmra.mxu1 %v2761_v33  ;;  %v3275_v33 = vld [vmem:[#allocation10 + $0x2a0] sm:$0xff] }
0x11d4   : > { %4734 = vmatpush3.msra.mxu1 %v2956_v59  ;;  %v4662_v32 = vpop.f32.mrf.mxu1  ;;  %4765 = vmatprep.mubr.msk.f32.mxu1 %vm5179_vm0, %v5178_v0  ;;  %v3276_v59 = vld [vmem:[#allocation10 + $0x2a8] sm:$0xff] }
0x11d5   : > { %4735 = vmatprep.subr.mxu1 %v5178_v0  ;;  %v3273_v32 = vld [vmem:[#allocation10 + $0x290] sm:$0xff] }
0x11d6   : > { %4736 = vmatpush3.msra.mxu1 %v2955_v31  ;;  %v3274_v31 = vld [vmem:[#allocation10 + $0x298] sm:$0xff] }
0x11d7   : > { %4737 = vmatprep.subr.mxu1 %v5178_v0 }
0x11d8   : > { %4738 = vmatpush3.msra.mxu1 %v2954_v34  ;;  %v3272_v34 = vld [vmem:[#allocation10 + $0x288] sm:$0xff] }
0x11d9   : > { %4739 = vmatprep.subr.mxu1 %v5178_v0 }
0x11da   : > { %4740 = vmatpush3.msra.mxu1 %v2953_v35 }
0x11db   : > { %4741 = vmatprep.subr.mxu1 %v5178_v0 }
0x11dc   : > { %4742 = vmatpush3.msra.mxu1 %v2952_v36 }
0x11dd   : > { %4743 = vmatprep.subr.mxu1 %v5178_v0 }
0x11de   : > { %4744 = vmatpush3.msra.mxu1 %v2951_v37 }
0x11df   : > { %4745 = vmatprep.subr.mxu1 %v5178_v0 }
0x11e0   : > { %4746 = vmatpush3.msra.mxu1 %v2950_v38  ;;  %v3271_v38 = vld [vmem:[#allocation10 + $0x280] sm:$0xff] }
0x11e1   : > { %4747 = vmatprep.subr.mxu1 %v5178_v0 }
0x11e2   : > { %4748 = vmatpush3.msra.mxu1 %v2949_v39 }
0x11e3   : > { %4749 = vmatprep.subr.mxu1 %v5178_v0 }
0x11e4   : > { %4750 = vmatpush3.msra.mxu1 %v2948_v40 }
0x11e5   : > { %4751 = vmatprep.subr.mxu1 %v5178_v0 }
0x11e6   : > { %4752 = vmatpush3.msra.mxu1 %v2947_v41 }
0x11e7   : > { %4753 = vmatprep.subr.mxu1 %v5178_v0 }
0x11e8   : > { %4754 = vmatpush3.msra.mxu1 %v2946_v42  ;;  %v3511_v42 = vld [vmem:[%s5992_s5] ss:$0 sm:$0xff] }
0x11e9   : > { %4755 = vmatprep.subr.mxu1 %v5178_v0 }
0x11ea   : > { %4756 = vmatpush3.msra.mxu1 %v2945_v43 }
0x11eb   : > { %4757 = vmatprep.subr.mxu1 %v5178_v0 }
0x11ec   : > { %4758 = vmatpush3.msra.mxu1 %v2944_v44 }
0x11ed   : > { %4759 = vmatprep.subr.mxu1 %v5178_v0 }
0x11ee   : > { %4760 = vmatpush3.msra.mxu1 %v2943_v45 }
0x11ef   : > { %4761 = vmatprep.subr.mxu1 %v5178_v0 }
0x11f0   : > { %4762 = vmatpush3.msra.mxu1 %v2942_v46 }
0x11f1   : > { %4763 = vmatprep.subr.mxu1 %v5178_v0 }
0x11f2   : > { %4764 = vmatpush3.msra.mxu1 %v2941_v48 }
0x11f3   : > { %4766 = vmatmul.mubr.f32.vlgmr.msra.gmra.mxu1 %v5874_v30  ;;  %4803 = vmatprep.subr.mxu1 %v5178_v0 }
0x11f4   : > { %4805 = vmatprep.mubr.msk.f32.mxu1 %vm5179_vm0, %v5178_v0 }
0x1293   : > { %v2848_v51 = vpop.f32.mrf.mxu1 }
0x1294   : > { %v5902_v52 = vadd.f32 %v2848_v51, %v5810_v22  ;;  %v3040_v22 = vld [vmem:[#allocation8 + $0x2e0] sm:$0xff] }
0x1295   : > { %v4697_v47 = vpop.f32.mrf.mxu1  ;;  %4775 = vmatpush3.msra.mxu0 %v3040_v22 }
0x1296   : > { %4776 = vmatprep.subr.mxu0 %v5178_v0 }
0x1297   : > { %4777 = vmatpush3.msra.mxu0 %v3039_v60 }
0x1298   : > { %4778 = vmatprep.subr.mxu0 %v5178_v0 }
0x1299   : > { %4779 = vmatpush3.msra.mxu0 %v3038_v61 }
0x129a   : > { %4780 = vmatprep.subr.mxu0 %v5178_v0 }
0x129b   : > { %4781 = vmatpush3.msra.mxu0 %v3037_v62 }
0x129c   : > { %4782 = vmatprep.subr.mxu0 %v5178_v0 }
0x129d   : > { %4783 = vmatpush3.msra.mxu0 %v3036_v63 }
0x129e   : > { %4784 = vmatprep.subr.mxu0 %v5178_v0 }
0x129f   : > { %4785 = vmatpush3.msra.mxu0 %v3035_v1 }
0x12a0   : > { %4786 = vmatprep.subr.mxu0 %v5178_v0 }
0x12a1   : > { %4787 = vmatpush3.msra.mxu0 %v3034_v2 }
0x12a2   : > { %4788 = vmatprep.subr.mxu0 %v5178_v0 }
0x12a3   : > { %4789 = vmatpush3.msra.mxu0 %v3033_v23 }
0x12a4   : > { %4790 = vmatprep.subr.mxu0 %v5178_v0 }
0x12a5   : > { %4791 = vmatpush3.msra.mxu0 %v3032_v27 }
0x12a6   : > { %4792 = vmatprep.subr.mxu0 %v5178_v0 }
0x12a7   : > { %4793 = vmatpush3.msra.mxu0 %v3031_v3 }
0x12a8   : > { %4794 = vmatprep.subr.mxu0 %v5178_v0 }
0x12a9   : > { %4795 = vmatpush3.msra.mxu0 %v3030_v4 }
0x12aa   : > { %4796 = vmatprep.subr.mxu0 %v5178_v0 }
0x12ab   : > { %4797 = vmatpush3.msra.mxu0 %v3029_v5 }
0x12ac   : > { %4798 = vmatprep.subr.mxu0 %v5178_v0 }
0x12ad   : > { %4799 = vmatpush3.msra.mxu0 %v3028_v6 }
0x12ae   : > { %4801 = vmatmul.mubr.f32.vlgmr.msra.gmra.mxu0 %v5874_v30  ;;  %4813 = vmatprep.subr.mxu0 %v5178_v0  ;;  %v3277_v30 = vld [vmem:[#allocation10 + $0x2b0] sm:$0xff] }
0x12af   : > { %4845 = vmatprep.mubr.msk.f32.mxu0 %vm5179_vm0, %v5178_v0  ;;  %4814 = vmatpush3.msra.mxu0 %v3286_v19 }
0x12b0   : > { %4815 = vmatprep.subr.mxu0 %v5178_v0 }
0x12b1   : > { %4816 = vmatpush3.msra.mxu0 %v3285_v20 }
0x12b2   : > { %4817 = vmatprep.subr.mxu0 %v5178_v0 }
0x12b3   : > { %v3023_v53 = vpop.f32.mrf.mxu1  ;;  %4818 = vmatpush3.msra.mxu0 %v3284_v58 }
0x12b4   : > { %4804 = vmatpush3.xpose.msra.mxu1 %v3023_v53  ;;  %4819 = vmatprep.subr.mxu0 %v5178_v0 }
0x12b5   : > { %v4767_v54 = vpop.f32.mrf.mxu1  ;;  %4808 = vmatprep.subr.mxu1 %v5178_v0  ;;  %4820 = vmatpush3.msra.mxu0 %v3283_v21 }
0x12b6   : > { %4821 = vmatprep.subr.mxu0 %v5178_v0 }
0x12b7   : > { %4806 = vmatmul.mubr.f32.vlgmr.msra.gmra.mxu1 %v2936_v49  ;;  %4822 = vmatpush3.msra.mxu0 %v3282_v24 }
0x12b8   : > { %4810 = vmatprep.mubr.msk.f32.mxu1 %vm5179_vm0, %v5178_v0  ;;  %4823 = vmatprep.subr.mxu0 %v5178_v0 }
0x12b9   : > { %4824 = vmatpush3.msra.mxu0 %v3281_v25 }
0x12ba   : > { %4825 = vmatprep.subr.mxu0 %v5178_v0 }
0x12bb   : > { %4826 = vmatpush3.msra.mxu0 %v3280_v26 }
0x12bc   : > { %4827 = vmatprep.subr.mxu0 %v5178_v0 }
0x12bd   : > { %4828 = vmatpush3.msra.mxu0 %v3279_v28 }
0x12be   : > { %4829 = vmatprep.subr.mxu0 %v5178_v0 }
0x12bf   : > { %4830 = vmatpush3.msra.mxu0 %v3278_v29 }
0x12c0   : > { %4831 = vmatprep.subr.mxu0 %v5178_v0 }
0x12c1   : > { %4832 = vmatpush3.msra.mxu0 %v3277_v30 }
0x12c2   : > { %4833 = vmatprep.subr.mxu0 %v5178_v0 }
0x12c3   : > { %4834 = vmatpush3.msra.mxu0 %v3276_v59 }
0x12c4   : > { %4835 = vmatprep.subr.mxu0 %v5178_v0 }
0x12c5   : > { %4836 = vmatpush3.msra.mxu0 %v3275_v33 }
0x12c6   : > { %4837 = vmatprep.subr.mxu0 %v5178_v0 }
0x12c7   : > { %4838 = vmatpush3.msra.mxu0 %v3274_v31 }
0x12c8   : > { %4839 = vmatprep.subr.mxu0 %v5178_v0 }
0x12c9   : > { %4840 = vmatpush3.msra.mxu0 %v3273_v32 }
0x12ca   : > { %4841 = vmatprep.subr.mxu0 %v5178_v0 }
0x12cb   : > { %4842 = vmatpush3.msra.mxu0 %v3272_v34 }
0x12cc   : > { %4843 = vmatprep.subr.mxu0 %v5178_v0 }
0x12cd   : > { %4844 = vmatpush3.msra.mxu0 %v3271_v38 }
0x136e   : > { %v3110_v17 = vpop.f32.mrf.mxu0 }
0x136f   : > { %4809 = vmatpush3.msra.mxu1 %v3110_v17 }
0x1370   : > { %v4802_v18 = vpop.f32.mrf.mxu0 }
0x1377   : > { %v3180_v7 = vpop.f32.mrf.mxu1 }
0x1378   : > { %v3184_v8 = vmul.f32 0.4082483, %v3180_v7 }
0x1379   : > { %v4807_v9 = vpop.f32.mrf.mxu1 }
0x137a   : > { %v3185_v10 = vsel %vm5469_vm3, %v3184_v8, -1e+30 }
0x137b   : > { %v3186_v11 = vsel %vm663_vm4, %v3185_v10, -inf }
0x137c   : > { %3187 = vmax.xlane.f32.xlu0 %v3186_v11 }
0x1405   : > { %v3188_v12 = vpop.xlane.xlu0 %3187 }
0x1406   : > { %v3189_v13 = vsub.f32 %v3185_v10, %v3188_v12 }
0x1408   : > { %v3190_v14 = vmul.f32 1.442695, %v3189_v13 }
0x140a   : > { %4959 = vpow2.f32 %v3190_v14 }
0x1417   : > { %v4960_v15 = vpop.eup %4959 }
0x1418   : > { %v3192_v16 = vsel %vm663_vm4, %v4960_v15, 0.0 }
0x1419   : > { %3193 = vadd.xlane.f32.xlu1 %v3192_v16 }
0x14a2   : > { %v3194_v35 = vpop.xlane.xlu1 %3193 }
0x14a3   : > { %4961 = vrcp.f32 %v3194_v35 }
0x14b0   : > { %v4962_v36 = vpop.eup %4961 }
0x14b1   : > { %v3196_v37 = vmul.f32 %v4962_v36, %v4960_v15 }
0x14b3   : > { %4811 = vmatmul.mubr.msk.f32.vlgmr.msra.gmra.mxu1 %vm663_vm4, %v3196_v37 }
0x1573   : > { %v3266_v39 = vpop.f32.mrf.mxu1 }
0x1574   : > { %4846 = vmatmul.mubr.f32.vlgmr.msra.gmra.mxu0 %v3266_v39 }
0x1575   : > { %v4812_v40 = vpop.f32.mrf.mxu1 }
0x1634   : > { %v3353_v41 = vpop.f32.mrf.mxu0 }
0x1635   : > { %v3357_v0 = vadd.f32 %v3353_v41, %v5902_v52 }
0x1636   : > { %v4847_v43 = vpop.f32.mrf.mxu0 }
0x1637   : > { %v3365_v44 = vadd.f32 %v3511_v42, %v3357_v0 }
0x1639   : > { %3366 = vst [vmem:[%s324_s30] sm:$0xff] %v3365_v44 }
0x163a   : > { %5110 = shalt.err (!%p5107_p11)
}
0x163b   : > { %s5111_s13 = scalar_lea.hbm %s3379_s18, 128  ;;  %s5115_s1 = scalar_lea.hbm %s5993_s6, 256 }
0x163c   : > { %p5112_p13 = scmp.ne.s32.totalorder %s3379_s18, %s5111_s13  ;;  %p5116_p4 = scmp.lt.s32.totalorder %s3379_s18, %s5993_s6 }
0x163d   : > { %p5117_p6 = scmp.lt.s32.totalorder %s5115_s1, %s5111_s13 }
0x163e   : > { %p5113_p1 = pnand %p5112_p13, %p6015_p7 }
0x163f   : > { %p5118_p5 = por %p5117_p6, %p5116_p4 }
0x1640   : > { %p5114_p3 = pneg %p5113_p1 }
0x1642   : > { %p5119_p8 = pnand %p5118_p5, %p5114_p3 }
0x1644   : > { %5122 = shalt.err (!%p5119_p8)
}
0x1645   : > { %4866 = dma.vmem_to_hbm [thread:$0]  (%p6015_p7), %s3382_s8, 128, %s3379_s18, %s3368_s25  }
0x1646 PF: > { %s3393_s26 = sand.u32 1, %s5157_s21   ;;  %p6016_p10 = scmp.ne.s32.totalorder %s6005_s17, 0 }
0x1647   : > { %p6017_p0 = scmp.ge.s32.totalorder %s5169_s24, 2  ;;  %s3394_s30 = scalar_lea.sflag [#allocation4], %s3393_s26 }
0x1649   : > { %p4886_p12 = pnand %p6017_p0, %p6016_p10 }
0x164b   : > { %p4887_p2 = pneg %p4886_p12 }
0x164d   : > { %5152 = dma.done.wait (%p4887_p2), %s3394_s30, 128  }
0x164e   : > { %5154 = vsyncadd (%p4887_p2), %s3394_s30, 4294967168  ;;  %p21_p9 = scmp.ge.s32.totalorder %s5317_s9, 4   ;;  %s6018_s21 = smov %s5161_s22 }
0x164f   : > { %s6019_s22 = smov %s5165_s23  ;;  %s6020_s23 = smov %s5328_s14 }
0x1650   : > { %s6021_s24 = smov %s5317_s9  ;;  %23 = sbr.rel (!%p21_p9) target bundleno = 9 (0x9), region = 125 }
0x1655   :  { %3399 = vsyncpa [#allocation3], 1 }
0x1656   :  { %3401 = vsyncpa [#allocation3 + $0x1], 1 }
0x1657   :  { %3402 = vsyncpa [#allocation6], 1 }
0x1658   :  { %3403 = vsyncpa [#allocation9], 1 }
0x1659   :  { %3404 = vsyncpa [#allocation4], 1 }
0x165a   :  { %3406 = vsyncpa [#allocation4 + $0x1], 1 }

</bundles_post_ra>
